<compile_context>
chip_gen: v7x
topology: tpu7x:2x2x1
jax: 0.10.0
libtpu: 0.0.40
codegen_flags: <defaults>
</compile_context>

<pallas_src>
import functools

import jax
import jax.numpy as jnp
from jax import lax
from jax.experimental import pallas as pl
from jax.experimental.pallas import tpu as pltpu


# ----------------------------- kernel ---------------------------------------


def _mha_fused_kernel(x_ref, wqkv_ref, wp_ref, bp_ref, o_ref, *,
                      batch, num_heads, head_size, scale):
    """Whole MHA forward in a single grid step.

    x_ref    : (B, T, C)      VMEM
    wqkv_ref : (3*H, C, hs)   VMEM  -- [Wq_0..Wq_{H-1} | Wk_0.. | Wv_0..] on axis 0
    wp_ref   : (C, C)         VMEM  -- output projection, math orientation (in, out)
    bp_ref   : (1, C)         VMEM
    o_ref    : (B, T, C)      VMEM
    """
    H, hs = num_heads, head_size
    bias = bp_ref[...]                                       # (1, C), hoisted

    for b in range(batch):                                   # tiny static loop, unrolled
        xb = x_ref[b]                                        # (T, C)
        y = jnp.zeros((xb.shape[0], wp_ref.shape[1]), jnp.float32)   # (T, C) accumulator

        for h in range(H):
            # Per-head projections: each result starts at lane 0 (no lane-offset slices).
            qh = jnp.dot(xb, wqkv_ref[h],
                         preferred_element_type=jnp.float32) * scale       # (T, hs)
            kh = jnp.dot(xb, wqkv_ref[H + h],
                         preferred_element_type=jnp.float32)               # (T, hs)
            vh = jnp.dot(xb, wqkv_ref[2 * H + h],
                         preferred_element_type=jnp.float32)               # (T, hs)

            # Scores: contract the hs dim of both operands directly -> no XLU transpose.
            wei = lax.dot_general(qh, kh, (((1,), (1,)), ((), ())),
                                  preferred_element_type=jnp.float32)      # (T, T)

            # Exact softmax (f32) -- matches the reference to fp32 accuracy.
            wei = wei - jnp.max(wei, axis=-1, keepdims=True)
            p = jnp.exp(wei)
            p = p / jnp.sum(p, axis=-1, keepdims=True)
            # TODO(synk): attention dropout skipped (eval mode -> identity).

            oh = jnp.dot(p, vh, preferred_element_type=jnp.float32)        # (T, hs)

            # Fold the output projection per head; Wp row slice at multiples of hs=8 is
            # a cheap sublane-addressed slice.  Avoids the lane-axis head concat.
            y = y + jnp.dot(oh, wp_ref[h * hs:(h + 1) * hs, :],
                            preferred_element_type=jnp.float32)

        # TODO(synk): output dropout skipped (eval mode -> identity).
        o_ref[b] = (y + bias).astype(o_ref.dtype)


# ----------------------------- wrapper ---------------------------------------


def pack_qkv_weights(wq, wk, wv):
    """One-time (model-build) packing: three (H, C, hs) -> one (3H, C, hs)."""
    return jnp.concatenate([wq, wk, wv], axis=0)


def multi_head_attention(x, wqkv, w_proj, b_proj):
    """x: (B, T, C); wqkv: (3H, C, hs) pre-packed; w_proj: (C, C); b_proj: (1, C)."""
    B, T, C = x.shape
    three_h, _, hs = wqkv.shape
    H = three_h // 3
    assert H * hs == C
    scale = float(C) ** -0.5   # torch code scales by C ** -0.5 (C = n_embed)

    kernel = functools.partial(_mha_fused_kernel, batch=B, num_heads=H,
                               head_size=hs, scale=scale)
    vmem_spec = lambda: pl.BlockSpec(memory_space=pltpu.MemorySpace.VMEM)

    # Single-step kernel: no grid, every operand lives whole in VMEM (a few KB total).
    return pl.pallas_call(
        kernel,
        out_shape=jax.ShapeDtypeStruct((B, T, C), x.dtype),
        in_specs=[vmem_spec(), vmem_spec(), vmem_spec(), vmem_spec()],
        out_specs=vmem_spec(),
    )(x, wqkv, w_proj, b_proj)


# ----------------------------- reference ------------------------------------


def multi_head_attention_ref(x, wq, wk, wv, w_proj, b_proj):
    B, T, C = x.shape
    hp = jax.lax.Precision.HIGHEST
    q = jnp.einsum("btc,hcd->bhtd", x, wq, precision=hp)
    k = jnp.einsum("btc,hcd->bhtd", x, wk, precision=hp)
    v = jnp.einsum("btc,hcd->bhtd", x, wv, precision=hp)
    wei = jnp.einsum("bhtd,bhsd->bhts", q, k, precision=hp) * (float(C) ** -0.5)
    wei = jax.nn.softmax(wei, axis=-1)
    out = jnp.einsum("bhts,bhsd->bhtd", wei, v, precision=hp)
    cat = out.transpose(0, 2, 1, 3).reshape(B, T, C)
    return jnp.dot(cat, w_proj, precision=hp) + b_proj


# ----------------------------- main ------------------------------------------


if __name__ == "__main__":
    # hyperparameters implied by the module
    B, T = 2, 8
    n_embed = 32
    num_heads = 4
    head_size = n_embed // num_heads  # 8

    key = jax.random.PRNGKey(0)
    kx, kq, kk, kv, kw, kb = jax.random.split(key, 6)

    x = jax.random.normal(kx, (B, T, n_embed), dtype=jnp.float32)
    wq = 0.1 * jax.random.normal(kq, (num_heads, n_embed, head_size), jnp.float32)
    wk = 0.1 * jax.random.normal(kk, (num_heads, n_embed, head_size), jnp.float32)
    wv = 0.1 * jax.random.normal(kv, (num_heads, n_embed, head_size), jnp.float32)
    w_proj = 0.1 * jax.random.normal(kw, (n_embed, n_embed), jnp.float32)
    b_proj = 0.1 * jax.random.normal(kb, (1, n_embed), jnp.float32)

    # Weight packing happens once, outside the forward path.
    wqkv = pack_qkv_weights(wq, wk, wv)                      # (3H, C, hs)

    out = multi_head_attention(x, wqkv, w_proj, b_proj)
    out = jax.block_until_ready(out)

    ref = multi_head_attention_ref(x, wq, wk, wv, w_proj, b_proj)
    assert out.shape == (B, T, n_embed)
    # Exact softmax -> only matmul-precision differences remain; 2e-3 is far below
    # any semantic error (wrong scale / head order / missing softmax) yet robust to
    # MXU-vs-XLA f32 pass differences on real hardware.
    assert jnp.allclose(out, ref, atol=2e-3, rtol=2e-3), float(jnp.max(jnp.abs(out - ref)))

    print("KERNEL_OK")
</pallas_src>

<mosaic_0001>
module attributes {stable_mosaic.version = 11 : i64} {
  func.func @_mha_fused_kernel(%arg0: memref<2x8x32xf32, #tpu.memory_space<vmem>>, %arg1: memref<12x32x8xf32, #tpu.memory_space<vmem>>, %arg2: memref<32x32xf32, #tpu.memory_space<vmem>>, %arg3: memref<1x32xf32, #tpu.memory_space<vmem>>, %arg4: memref<2x8x32xf32, #tpu.memory_space<vmem>>) attributes {dimension_semantics = [], scalar_prefetch = 0 : i64, scratch_operands = 0 : i64, tpu.core_type = #tpu.core_type<tc>} {
    %c0 = arith.constant 0 : index
    %c0_0 = arith.constant 0 : index
    %0 = vector.load %arg3[%c0, %c0_0] : memref<1x32xf32, #tpu.memory_space<vmem>>, vector<1x32xf32>
    %c0_1 = arith.constant 0 : index
    %c0_2 = arith.constant 0 : index
    %c0_3 = arith.constant 0 : index
    %1 = vector.load %arg0[%c0_1, %c0_2, %c0_3] : memref<2x8x32xf32, #tpu.memory_space<vmem>>, vector<1x8x32xf32>
    %2 = vector.shape_cast %1 : vector<1x8x32xf32> to vector<8x32xf32>
    %cst = arith.constant 0.000000e+00 : f32
    %3 = vector.broadcast %cst : f32 to vector<8x32xf32>
    %c0_4 = arith.constant 0 : index
    %c0_5 = arith.constant 0 : index
    %c0_6 = arith.constant 0 : index
    %4 = vector.load %arg1[%c0_4, %c0_5, %c0_6] : memref<12x32x8xf32, #tpu.memory_space<vmem>>, vector<1x32x8xf32>
    %5 = vector.shape_cast %4 : vector<1x32x8xf32> to vector<32x8xf32>
    %cst_7 = arith.constant dense<0.000000e+00> : vector<8x8xf32>
    %6 = tpu.matmul %2, %5, %cst_7 {dimension_numbers = #tpu.dot_dimension_numbers<[1], [0], [0], [1], [0, 0, 1, 1], [], []>} : vector<8x32xf32>, vector<32x8xf32>, vector<8x8xf32> -> vector<8x8xf32>
    %cst_8 = arith.constant 0.176776692 : f32
    %7 = vector.broadcast %cst_8 : f32 to vector<8x8xf32>
    %8 = arith.mulf %6, %7 : vector<8x8xf32>
    %c4 = arith.constant 4 : index
    %c0_9 = arith.constant 0 : index
    %c0_10 = arith.constant 0 : index
    %9 = vector.load %arg1[%c4, %c0_9, %c0_10] : memref<12x32x8xf32, #tpu.memory_space<vmem>>, vector<1x32x8xf32>
    %10 = vector.shape_cast %9 : vector<1x32x8xf32> to vector<32x8xf32>
    %cst_11 = arith.constant dense<0.000000e+00> : vector<8x8xf32>
    %11 = tpu.matmul %2, %10, %cst_11 {dimension_numbers = #tpu.dot_dimension_numbers<[1], [0], [0], [1], [0, 0, 1, 1], [], []>} : vector<8x32xf32>, vector<32x8xf32>, vector<8x8xf32> -> vector<8x8xf32>
    %c8 = arith.constant 8 : index
    %c0_12 = arith.constant 0 : index
    %c0_13 = arith.constant 0 : index
    %12 = vector.load %arg1[%c8, %c0_12, %c0_13] : memref<12x32x8xf32, #tpu.memory_space<vmem>>, vector<1x32x8xf32>
    %13 = vector.shape_cast %12 : vector<1x32x8xf32> to vector<32x8xf32>
    %cst_14 = arith.constant dense<0.000000e+00> : vector<8x8xf32>
    %14 = tpu.matmul %2, %13, %cst_14 {dimension_numbers = #tpu.dot_dimension_numbers<[1], [0], [0], [1], [0, 0, 1, 1], [], []>} : vector<8x32xf32>, vector<32x8xf32>, vector<8x8xf32> -> vector<8x8xf32>
    %cst_15 = arith.constant dense<0.000000e+00> : vector<8x8xf32>
    %15 = tpu.matmul %8, %11, %cst_15 {dimension_numbers = #tpu.dot_dimension_numbers<[1], [1], [0], [0], [0, 0, 1, 0], [], []>} : vector<8x8xf32>, vector<8x8xf32>, vector<8x8xf32> -> vector<8x8xf32>
    %cst_16 = arith.constant dense<0xFF800000> : vector<8xf32>
    %16 = vector.multi_reduction <maximumf>, %15, %cst_16 [1] : vector<8x8xf32> to vector<8xf32>
    %17 = vector.shape_cast %16 : vector<8xf32> to vector<8x1xf32>
    %18 = vector.broadcast %17 : vector<8x1xf32> to vector<8x8xf32>
    %19 = arith.subf %15, %18 : vector<8x8xf32>
    %20 = math.exp %19 : vector<8x8xf32>
    %cst_17 = arith.constant dense<0.000000e+00> : vector<8xf32>
    %21 = vector.multi_reduction <add>, %20, %cst_17 [1] : vector<8x8xf32> to vector<8xf32>
    %22 = vector.shape_cast %21 : vector<8xf32> to vector<8x1xf32>
    %23 = vector.broadcast %22 : vector<8x1xf32> to vector<8x8xf32>
    %24 = arith.divf %20, %23 : vector<8x8xf32>
    %cst_18 = arith.constant dense<0.000000e+00> : vector<8x8xf32>
    %25 = tpu.matmul %24, %14, %cst_18 {dimension_numbers = #tpu.dot_dimension_numbers<[1], [0], [0], [1], [0, 0, 1, 1], [], []>} : vector<8x8xf32>, vector<8x8xf32>, vector<8x8xf32> -> vector<8x8xf32>
    %c0_19 = arith.constant 0 : index
    %c0_20 = arith.constant 0 : index
    %26 = vector.load %arg2[%c0_19, %c0_20] : memref<32x32xf32, #tpu.memory_space<vmem>>, vector<8x32xf32>
    %cst_21 = arith.constant dense<0.000000e+00> : vector<8x32xf32>
    %27 = tpu.matmul %25, %26, %cst_21 {dimension_numbers = #tpu.dot_dimension_numbers<[1], [0], [0], [1], [0, 0, 1, 1], [], []>} : vector<8x8xf32>, vector<8x32xf32>, vector<8x32xf32> -> vector<8x32xf32>
    %28 = arith.addf %3, %27 : vector<8x32xf32>
    %c1 = arith.constant 1 : index
    %c0_22 = arith.constant 0 : index
    %c0_23 = arith.constant 0 : index
    %29 = vector.load %arg1[%c1, %c0_22, %c0_23] : memref<12x32x8xf32, #tpu.memory_space<vmem>>, vector<1x32x8xf32>
    %30 = vector.shape_cast %29 : vector<1x32x8xf32> to vector<32x8xf32>
    %cst_24 = arith.constant dense<0.000000e+00> : vector<8x8xf32>
    %31 = tpu.matmul %2, %30, %cst_24 {dimension_numbers = #tpu.dot_dimension_numbers<[1], [0], [0], [1], [0, 0, 1, 1], [], []>} : vector<8x32xf32>, vector<32x8xf32>, vector<8x8xf32> -> vector<8x8xf32>
    %cst_25 = arith.constant 0.176776692 : f32
    %32 = vector.broadcast %cst_25 : f32 to vector<8x8xf32>
    %33 = arith.mulf %31, %32 : vector<8x8xf32>
    %c5 = arith.constant 5 : index
    %c0_26 = arith.constant 0 : index
    %c0_27 = arith.constant 0 : index
    %34 = vector.load %arg1[%c5, %c0_26, %c0_27] : memref<12x32x8xf32, #tpu.memory_space<vmem>>, vector<1x32x8xf32>
    %35 = vector.shape_cast %34 : vector<1x32x8xf32> to vector<32x8xf32>
    %cst_28 = arith.constant dense<0.000000e+00> : vector<8x8xf32>
    %36 = tpu.matmul %2, %35, %cst_28 {dimension_numbers = #tpu.dot_dimension_numbers<[1], [0], [0], [1], [0, 0, 1, 1], [], []>} : vector<8x32xf32>, vector<32x8xf32>, vector<8x8xf32> -> vector<8x8xf32>
    %c9 = arith.constant 9 : index
    %c0_29 = arith.constant 0 : index
    %c0_30 = arith.constant 0 : index
    %37 = vector.load %arg1[%c9, %c0_29, %c0_30] : memref<12x32x8xf32, #tpu.memory_space<vmem>>, vector<1x32x8xf32>
    %38 = vector.shape_cast %37 : vector<1x32x8xf32> to vector<32x8xf32>
    %cst_31 = arith.constant dense<0.000000e+00> : vector<8x8xf32>
    %39 = tpu.matmul %2, %38, %cst_31 {dimension_numbers = #tpu.dot_dimension_numbers<[1], [0], [0], [1], [0, 0, 1, 1], [], []>} : vector<8x32xf32>, vector<32x8xf32>, vector<8x8xf32> -> vector<8x8xf32>
    %cst_32 = arith.constant dense<0.000000e+00> : vector<8x8xf32>
    %40 = tpu.matmul %33, %36, %cst_32 {dimension_numbers = #tpu.dot_dimension_numbers<[1], [1], [0], [0], [0, 0, 1, 0], [], []>} : vector<8x8xf32>, vector<8x8xf32>, vector<8x8xf32> -> vector<8x8xf32>
    %cst_33 = arith.constant dense<0xFF800000> : vector<8xf32>
    %41 = vector.multi_reduction <maximumf>, %40, %cst_33 [1] : vector<8x8xf32> to vector<8xf32>
    %42 = vector.shape_cast %41 : vector<8xf32> to vector<8x1xf32>
    %43 = vector.broadcast %42 : vector<8x1xf32> to vector<8x8xf32>
    %44 = arith.subf %40, %43 : vector<8x8xf32>
    %45 = math.exp %44 : vector<8x8xf32>
    %cst_34 = arith.constant dense<0.000000e+00> : vector<8xf32>
    %46 = vector.multi_reduction <add>, %45, %cst_34 [1] : vector<8x8xf32> to vector<8xf32>
    %47 = vector.shape_cast %46 : vector<8xf32> to vector<8x1xf32>
    %48 = vector.broadcast %47 : vector<8x1xf32> to vector<8x8xf32>
    %49 = arith.divf %45, %48 : vector<8x8xf32>
    %cst_35 = arith.constant dense<0.000000e+00> : vector<8x8xf32>
    %50 = tpu.matmul %49, %39, %cst_35 {dimension_numbers = #tpu.dot_dimension_numbers<[1], [0], [0], [1], [0, 0, 1, 1], [], []>} : vector<8x8xf32>, vector<8x8xf32>, vector<8x8xf32> -> vector<8x8xf32>
    %c8_36 = arith.constant 8 : index
    %c0_37 = arith.constant 0 : index
    %51 = vector.load %arg2[%c8_36, %c0_37] : memref<32x32xf32, #tpu.memory_space<vmem>>, vector<8x32xf32>
    %cst_38 = arith.constant dense<0.000000e+00> : vector<8x32xf32>
    %52 = tpu.matmul %50, %51, %cst_38 {dimension_numbers = #tpu.dot_dimension_numbers<[1], [0], [0], [1], [0, 0, 1, 1], [], []>} : vector<8x8xf32>, vector<8x32xf32>, vector<8x32xf32> -> vector<8x32xf32>
    %53 = arith.addf %28, %52 : vector<8x32xf32>
    %c2 = arith.constant 2 : index
    %c0_39 = arith.constant 0 : index
    %c0_40 = arith.constant 0 : index
    %54 = vector.load %arg1[%c2, %c0_39, %c0_40] : memref<12x32x8xf32, #tpu.memory_space<vmem>>, vector<1x32x8xf32>
    %55 = vector.shape_cast %54 : vector<1x32x8xf32> to vector<32x8xf32>
    %cst_41 = arith.constant dense<0.000000e+00> : vector<8x8xf32>
    %56 = tpu.matmul %2, %55, %cst_41 {dimension_numbers = #tpu.dot_dimension_numbers<[1], [0], [0], [1], [0, 0, 1, 1], [], []>} : vector<8x32xf32>, vector<32x8xf32>, vector<8x8xf32> -> vector<8x8xf32>
    %cst_42 = arith.constant 0.176776692 : f32
    %57 = vector.broadcast %cst_42 : f32 to vector<8x8xf32>
    %58 = arith.mulf %56, %57 : vector<8x8xf32>
    %c6 = arith.constant 6 : index
    %c0_43 = arith.constant 0 : index
    %c0_44 = arith.constant 0 : index
    %59 = vector.load %arg1[%c6, %c0_43, %c0_44] : memref<12x32x8xf32, #tpu.memory_space<vmem>>, vector<1x32x8xf32>
    %60 = vector.shape_cast %59 : vector<1x32x8xf32> to vector<32x8xf32>
    %cst_45 = arith.constant dense<0.000000e+00> : vector<8x8xf32>
    %61 = tpu.matmul %2, %60, %cst_45 {dimension_numbers = #tpu.dot_dimension_numbers<[1], [0], [0], [1], [0, 0, 1, 1], [], []>} : vector<8x32xf32>, vector<32x8xf32>, vector<8x8xf32> -> vector<8x8xf32>
    %c10 = arith.constant 10 : index
    %c0_46 = arith.constant 0 : index
    %c0_47 = arith.constant 0 : index
    %62 = vector.load %arg1[%c10, %c0_46, %c0_47] : memref<12x32x8xf32, #tpu.memory_space<vmem>>, vector<1x32x8xf32>
    %63 = vector.shape_cast %62 : vector<1x32x8xf32> to vector<32x8xf32>
    %cst_48 = arith.constant dense<0.000000e+00> : vector<8x8xf32>
    %64 = tpu.matmul %2, %63, %cst_48 {dimension_numbers = #tpu.dot_dimension_numbers<[1], [0], [0], [1], [0, 0, 1, 1], [], []>} : vector<8x32xf32>, vector<32x8xf32>, vector<8x8xf32> -> vector<8x8xf32>
    %cst_49 = arith.constant dense<0.000000e+00> : vector<8x8xf32>
    %65 = tpu.matmul %58, %61, %cst_49 {dimension_numbers = #tpu.dot_dimension_numbers<[1], [1], [0], [0], [0, 0, 1, 0], [], []>} : vector<8x8xf32>, vector<8x8xf32>, vector<8x8xf32> -> vector<8x8xf32>
    %cst_50 = arith.constant dense<0xFF800000> : vector<8xf32>
    %66 = vector.multi_reduction <maximumf>, %65, %cst_50 [1] : vector<8x8xf32> to vector<8xf32>
    %67 = vector.shape_cast %66 : vector<8xf32> to vector<8x1xf32>
    %68 = vector.broadcast %67 : vector<8x1xf32> to vector<8x8xf32>
    %69 = arith.subf %65, %68 : vector<8x8xf32>
    %70 = math.exp %69 : vector<8x8xf32>
    %cst_51 = arith.constant dense<0.000000e+00> : vector<8xf32>
    %71 = vector.multi_reduction <add>, %70, %cst_51 [1] : vector<8x8xf32> to vector<8xf32>
    %72 = vector.shape_cast %71 : vector<8xf32> to vector<8x1xf32>
    %73 = vector.broadcast %72 : vector<8x1xf32> to vector<8x8xf32>
    %74 = arith.divf %70, %73 : vector<8x8xf32>
    %cst_52 = arith.constant dense<0.000000e+00> : vector<8x8xf32>
    %75 = tpu.matmul %74, %64, %cst_52 {dimension_numbers = #tpu.dot_dimension_numbers<[1], [0], [0], [1], [0, 0, 1, 1], [], []>} : vector<8x8xf32>, vector<8x8xf32>, vector<8x8xf32> -> vector<8x8xf32>
    %c16 = arith.constant 16 : index
    %c0_53 = arith.constant 0 : index
    %76 = vector.load %arg2[%c16, %c0_53] : memref<32x32xf32, #tpu.memory_space<vmem>>, vector<8x32xf32>
    %cst_54 = arith.constant dense<0.000000e+00> : vector<8x32xf32>
    %77 = tpu.matmul %75, %76, %cst_54 {dimension_numbers = #tpu.dot_dimension_numbers<[1], [0], [0], [1], [0, 0, 1, 1], [], []>} : vector<8x8xf32>, vector<8x32xf32>, vector<8x32xf32> -> vector<8x32xf32>
    %78 = arith.addf %53, %77 : vector<8x32xf32>
    %c3 = arith.constant 3 : index
    %c0_55 = arith.constant 0 : index
    %c0_56 = arith.constant 0 : index
    %79 = vector.load %arg1[%c3, %c0_55, %c0_56] : memref<12x32x8xf32, #tpu.memory_space<vmem>>, vector<1x32x8xf32>
    %80 = vector.shape_cast %79 : vector<1x32x8xf32> to vector<32x8xf32>
    %cst_57 = arith.constant dense<0.000000e+00> : vector<8x8xf32>
    %81 = tpu.matmul %2, %80, %cst_57 {dimension_numbers = #tpu.dot_dimension_numbers<[1], [0], [0], [1], [0, 0, 1, 1], [], []>} : vector<8x32xf32>, vector<32x8xf32>, vector<8x8xf32> -> vector<8x8xf32>
    %cst_58 = arith.constant 0.176776692 : f32
    %82 = vector.broadcast %cst_58 : f32 to vector<8x8xf32>
    %83 = arith.mulf %81, %82 : vector<8x8xf32>
    %c7 = arith.constant 7 : index
    %c0_59 = arith.constant 0 : index
    %c0_60 = arith.constant 0 : index
    %84 = vector.load %arg1[%c7, %c0_59, %c0_60] : memref<12x32x8xf32, #tpu.memory_space<vmem>>, vector<1x32x8xf32>
    %85 = vector.shape_cast %84 : vector<1x32x8xf32> to vector<32x8xf32>
    %cst_61 = arith.constant dense<0.000000e+00> : vector<8x8xf32>
    %86 = tpu.matmul %2, %85, %cst_61 {dimension_numbers = #tpu.dot_dimension_numbers<[1], [0], [0], [1], [0, 0, 1, 1], [], []>} : vector<8x32xf32>, vector<32x8xf32>, vector<8x8xf32> -> vector<8x8xf32>
    %c11 = arith.constant 11 : index
    %c0_62 = arith.constant 0 : index
    %c0_63 = arith.constant 0 : index
    %87 = vector.load %arg1[%c11, %c0_62, %c0_63] : memref<12x32x8xf32, #tpu.memory_space<vmem>>, vector<1x32x8xf32>
    %88 = vector.shape_cast %87 : vector<1x32x8xf32> to vector<32x8xf32>
    %cst_64 = arith.constant dense<0.000000e+00> : vector<8x8xf32>
    %89 = tpu.matmul %2, %88, %cst_64 {dimension_numbers = #tpu.dot_dimension_numbers<[1], [0], [0], [1], [0, 0, 1, 1], [], []>} : vector<8x32xf32>, vector<32x8xf32>, vector<8x8xf32> -> vector<8x8xf32>
    %cst_65 = arith.constant dense<0.000000e+00> : vector<8x8xf32>
    %90 = tpu.matmul %83, %86, %cst_65 {dimension_numbers = #tpu.dot_dimension_numbers<[1], [1], [0], [0], [0, 0, 1, 0], [], []>} : vector<8x8xf32>, vector<8x8xf32>, vector<8x8xf32> -> vector<8x8xf32>
    %cst_66 = arith.constant dense<0xFF800000> : vector<8xf32>
    %91 = vector.multi_reduction <maximumf>, %90, %cst_66 [1] : vector<8x8xf32> to vector<8xf32>
    %92 = vector.shape_cast %91 : vector<8xf32> to vector<8x1xf32>
    %93 = vector.broadcast %92 : vector<8x1xf32> to vector<8x8xf32>
    %94 = arith.subf %90, %93 : vector<8x8xf32>
    %95 = math.exp %94 : vector<8x8xf32>
    %cst_67 = arith.constant dense<0.000000e+00> : vector<8xf32>
    %96 = vector.multi_reduction <add>, %95, %cst_67 [1] : vector<8x8xf32> to vector<8xf32>
    %97 = vector.shape_cast %96 : vector<8xf32> to vector<8x1xf32>
    %98 = vector.broadcast %97 : vector<8x1xf32> to vector<8x8xf32>
    %99 = arith.divf %95, %98 : vector<8x8xf32>
    %cst_68 = arith.constant dense<0.000000e+00> : vector<8x8xf32>
    %100 = tpu.matmul %99, %89, %cst_68 {dimension_numbers = #tpu.dot_dimension_numbers<[1], [0], [0], [1], [0, 0, 1, 1], [], []>} : vector<8x8xf32>, vector<8x8xf32>, vector<8x8xf32> -> vector<8x8xf32>
    %c24 = arith.constant 24 : index
    %c0_69 = arith.constant 0 : index
    %101 = vector.load %arg2[%c24, %c0_69] : memref<32x32xf32, #tpu.memory_space<vmem>>, vector<8x32xf32>
    %cst_70 = arith.constant dense<0.000000e+00> : vector<8x32xf32>
    %102 = tpu.matmul %100, %101, %cst_70 {dimension_numbers = #tpu.dot_dimension_numbers<[1], [0], [0], [1], [0, 0, 1, 1], [], []>} : vector<8x8xf32>, vector<8x32xf32>, vector<8x32xf32> -> vector<8x32xf32>
    %103 = arith.addf %78, %102 : vector<8x32xf32>
    %104 = vector.broadcast %0 : vector<1x32xf32> to vector<8x32xf32>
    %105 = arith.addf %103, %104 : vector<8x32xf32>
    %c0_71 = arith.constant 0 : index
    %c0_72 = arith.constant 0 : index
    %c0_73 = arith.constant 0 : index
    %106 = vector.load %arg4[%c0_71, %c0_72, %c0_73] : memref<2x8x32xf32, #tpu.memory_space<vmem>>, vector<1x8x32xf32>
    %107 = vector.shape_cast %106 : vector<1x8x32xf32> to vector<8x32xf32>
    %108 = vector.shape_cast %105 : vector<8x32xf32> to vector<1x8x32xf32>
    tpu.vector_store %arg4[%c0_71, %c0_72, %c0_73], %108 {strides = array<i32>} : memref<2x8x32xf32, #tpu.memory_space<vmem>>, vector<1x8x32xf32>,
    %c1_74 = arith.constant 1 : index
    %c0_75 = arith.constant 0 : index
    %c0_76 = arith.constant 0 : index
    %109 = vector.load %arg0[%c1_74, %c0_75, %c0_76] : memref<2x8x32xf32, #tpu.memory_space<vmem>>, vector<1x8x32xf32>
    %110 = vector.shape_cast %109 : vector<1x8x32xf32> to vector<8x32xf32>
    %cst_77 = arith.constant 0.000000e+00 : f32
    %111 = vector.broadcast %cst_77 : f32 to vector<8x32xf32>
    %c0_78 = arith.constant 0 : index
    %c0_79 = arith.constant 0 : index
    %c0_80 = arith.constant 0 : index
    %112 = vector.load %arg1[%c0_78, %c0_79, %c0_80] : memref<12x32x8xf32, #tpu.memory_space<vmem>>, vector<1x32x8xf32>
    %113 = vector.shape_cast %112 : vector<1x32x8xf32> to vector<32x8xf32>
    %cst_81 = arith.constant dense<0.000000e+00> : vector<8x8xf32>
    %114 = tpu.matmul %110, %113, %cst_81 {dimension_numbers = #tpu.dot_dimension_numbers<[1], [0], [0], [1], [0, 0, 1, 1], [], []>} : vector<8x32xf32>, vector<32x8xf32>, vector<8x8xf32> -> vector<8x8xf32>
    %cst_82 = arith.constant 0.176776692 : f32
    %115 = vector.broadcast %cst_82 : f32 to vector<8x8xf32>
    %116 = arith.mulf %114, %115 : vector<8x8xf32>
    %c4_83 = arith.constant 4 : index
    %c0_84 = arith.constant 0 : index
    %c0_85 = arith.constant 0 : index
    %117 = vector.load %arg1[%c4_83, %c0_84, %c0_85] : memref<12x32x8xf32, #tpu.memory_space<vmem>>, vector<1x32x8xf32>
    %118 = vector.shape_cast %117 : vector<1x32x8xf32> to vector<32x8xf32>
    %cst_86 = arith.constant dense<0.000000e+00> : vector<8x8xf32>
    %119 = tpu.matmul %110, %118, %cst_86 {dimension_numbers = #tpu.dot_dimension_numbers<[1], [0], [0], [1], [0, 0, 1, 1], [], []>} : vector<8x32xf32>, vector<32x8xf32>, vector<8x8xf32> -> vector<8x8xf32>
    %c8_87 = arith.constant 8 : index
    %c0_88 = arith.constant 0 : index
    %c0_89 = arith.constant 0 : index
    %120 = vector.load %arg1[%c8_87, %c0_88, %c0_89] : memref<12x32x8xf32, #tpu.memory_space<vmem>>, vector<1x32x8xf32>
    %121 = vector.shape_cast %120 : vector<1x32x8xf32> to vector<32x8xf32>
    %cst_90 = arith.constant dense<0.000000e+00> : vector<8x8xf32>
    %122 = tpu.matmul %110, %121, %cst_90 {dimension_numbers = #tpu.dot_dimension_numbers<[1], [0], [0], [1], [0, 0, 1, 1], [], []>} : vector<8x32xf32>, vector<32x8xf32>, vector<8x8xf32> -> vector<8x8xf32>
    %cst_91 = arith.constant dense<0.000000e+00> : vector<8x8xf32>
    %123 = tpu.matmul %116, %119, %cst_91 {dimension_numbers = #tpu.dot_dimension_numbers<[1], [1], [0], [0], [0, 0, 1, 0], [], []>} : vector<8x8xf32>, vector<8x8xf32>, vector<8x8xf32> -> vector<8x8xf32>
    %cst_92 = arith.constant dense<0xFF800000> : vector<8xf32>
    %124 = vector.multi_reduction <maximumf>, %123, %cst_92 [1] : vector<8x8xf32> to vector<8xf32>
    %125 = vector.shape_cast %124 : vector<8xf32> to vector<8x1xf32>
    %126 = vector.broadcast %125 : vector<8x1xf32> to vector<8x8xf32>
    %127 = arith.subf %123, %126 : vector<8x8xf32>
    %128 = math.exp %127 : vector<8x8xf32>
    %cst_93 = arith.constant dense<0.000000e+00> : vector<8xf32>
    %129 = vector.multi_reduction <add>, %128, %cst_93 [1] : vector<8x8xf32> to vector<8xf32>
    %130 = vector.shape_cast %129 : vector<8xf32> to vector<8x1xf32>
    %131 = vector.broadcast %130 : vector<8x1xf32> to vector<8x8xf32>
    %132 = arith.divf %128, %131 : vector<8x8xf32>
    %cst_94 = arith.constant dense<0.000000e+00> : vector<8x8xf32>
    %133 = tpu.matmul %132, %122, %cst_94 {dimension_numbers = #tpu.dot_dimension_numbers<[1], [0], [0], [1], [0, 0, 1, 1], [], []>} : vector<8x8xf32>, vector<8x8xf32>, vector<8x8xf32> -> vector<8x8xf32>
    %c0_95 = arith.constant 0 : index
    %c0_96 = arith.constant 0 : index
    %134 = vector.load %arg2[%c0_95, %c0_96] : memref<32x32xf32, #tpu.memory_space<vmem>>, vector<8x32xf32>
    %cst_97 = arith.constant dense<0.000000e+00> : vector<8x32xf32>
    %135 = tpu.matmul %133, %134, %cst_97 {dimension_numbers = #tpu.dot_dimension_numbers<[1], [0], [0], [1], [0, 0, 1, 1], [], []>} : vector<8x8xf32>, vector<8x32xf32>, vector<8x32xf32> -> vector<8x32xf32>
    %136 = arith.addf %111, %135 : vector<8x32xf32>
    %c1_98 = arith.constant 1 : index
    %c0_99 = arith.constant 0 : index
    %c0_100 = arith.constant 0 : index
    %137 = vector.load %arg1[%c1_98, %c0_99, %c0_100] : memref<12x32x8xf32, #tpu.memory_space<vmem>>, vector<1x32x8xf32>
    %138 = vector.shape_cast %137 : vector<1x32x8xf32> to vector<32x8xf32>
    %cst_101 = arith.constant dense<0.000000e+00> : vector<8x8xf32>
    %139 = tpu.matmul %110, %138, %cst_101 {dimension_numbers = #tpu.dot_dimension_numbers<[1], [0], [0], [1], [0, 0, 1, 1], [], []>} : vector<8x32xf32>, vector<32x8xf32>, vector<8x8xf32> -> vector<8x8xf32>
    %cst_102 = arith.constant 0.176776692 : f32
    %140 = vector.broadcast %cst_102 : f32 to vector<8x8xf32>
    %141 = arith.mulf %139, %140 : vector<8x8xf32>
    %c5_103 = arith.constant 5 : index
    %c0_104 = arith.constant 0 : index
    %c0_105 = arith.constant 0 : index
    %142 = vector.load %arg1[%c5_103, %c0_104, %c0_105] : memref<12x32x8xf32, #tpu.memory_space<vmem>>, vector<1x32x8xf32>
    %143 = vector.shape_cast %142 : vector<1x32x8xf32> to vector<32x8xf32>
    %cst_106 = arith.constant dense<0.000000e+00> : vector<8x8xf32>
    %144 = tpu.matmul %110, %143, %cst_106 {dimension_numbers = #tpu.dot_dimension_numbers<[1], [0], [0], [1], [0, 0, 1, 1], [], []>} : vector<8x32xf32>, vector<32x8xf32>, vector<8x8xf32> -> vector<8x8xf32>
    %c9_107 = arith.constant 9 : index
    %c0_108 = arith.constant 0 : index
    %c0_109 = arith.constant 0 : index
    %145 = vector.load %arg1[%c9_107, %c0_108, %c0_109] : memref<12x32x8xf32, #tpu.memory_space<vmem>>, vector<1x32x8xf32>
    %146 = vector.shape_cast %145 : vector<1x32x8xf32> to vector<32x8xf32>
    %cst_110 = arith.constant dense<0.000000e+00> : vector<8x8xf32>
    %147 = tpu.matmul %110, %146, %cst_110 {dimension_numbers = #tpu.dot_dimension_numbers<[1], [0], [0], [1], [0, 0, 1, 1], [], []>} : vector<8x32xf32>, vector<32x8xf32>, vector<8x8xf32> -> vector<8x8xf32>
    %cst_111 = arith.constant dense<0.000000e+00> : vector<8x8xf32>
    %148 = tpu.matmul %141, %144, %cst_111 {dimension_numbers = #tpu.dot_dimension_numbers<[1], [1], [0], [0], [0, 0, 1, 0], [], []>} : vector<8x8xf32>, vector<8x8xf32>, vector<8x8xf32> -> vector<8x8xf32>
    %cst_112 = arith.constant dense<0xFF800000> : vector<8xf32>
    %149 = vector.multi_reduction <maximumf>, %148, %cst_112 [1] : vector<8x8xf32> to vector<8xf32>
    %150 = vector.shape_cast %149 : vector<8xf32> to vector<8x1xf32>
    %151 = vector.broadcast %150 : vector<8x1xf32> to vector<8x8xf32>
    %152 = arith.subf %148, %151 : vector<8x8xf32>
    %153 = math.exp %152 : vector<8x8xf32>
    %cst_113 = arith.constant dense<0.000000e+00> : vector<8xf32>
    %154 = vector.multi_reduction <add>, %153, %cst_113 [1] : vector<8x8xf32> to vector<8xf32>
    %155 = vector.shape_cast %154 : vector<8xf32> to vector<8x1xf32>
    %156 = vector.broadcast %155 : vector<8x1xf32> to vector<8x8xf32>
    %157 = arith.divf %153, %156 : vector<8x8xf32>
    %cst_114 = arith.constant dense<0.000000e+00> : vector<8x8xf32>
    %158 = tpu.matmul %157, %147, %cst_114 {dimension_numbers = #tpu.dot_dimension_numbers<[1], [0], [0], [1], [0, 0, 1, 1], [], []>} : vector<8x8xf32>, vector<8x8xf32>, vector<8x8xf32> -> vector<8x8xf32>
    %c8_115 = arith.constant 8 : index
    %c0_116 = arith.constant 0 : index
    %159 = vector.load %arg2[%c8_115, %c0_116] : memref<32x32xf32, #tpu.memory_space<vmem>>, vector<8x32xf32>
    %cst_117 = arith.constant dense<0.000000e+00> : vector<8x32xf32>
    %160 = tpu.matmul %158, %159, %cst_117 {dimension_numbers = #tpu.dot_dimension_numbers<[1], [0], [0], [1], [0, 0, 1, 1], [], []>} : vector<8x8xf32>, vector<8x32xf32>, vector<8x32xf32> -> vector<8x32xf32>
    %161 = arith.addf %136, %160 : vector<8x32xf32>
    %c2_118 = arith.constant 2 : index
    %c0_119 = arith.constant 0 : index
    %c0_120 = arith.constant 0 : index
    %162 = vector.load %arg1[%c2_118, %c0_119, %c0_120] : memref<12x32x8xf32, #tpu.memory_space<vmem>>, vector<1x32x8xf32>
    %163 = vector.shape_cast %162 : vector<1x32x8xf32> to vector<32x8xf32>
    %cst_121 = arith.constant dense<0.000000e+00> : vector<8x8xf32>
    %164 = tpu.matmul %110, %163, %cst_121 {dimension_numbers = #tpu.dot_dimension_numbers<[1], [0], [0], [1], [0, 0, 1, 1], [], []>} : vector<8x32xf32>, vector<32x8xf32>, vector<8x8xf32> -> vector<8x8xf32>
    %cst_122 = arith.constant 0.176776692 : f32
    %165 = vector.broadcast %cst_122 : f32 to vector<8x8xf32>
    %166 = arith.mulf %164, %165 : vector<8x8xf32>
    %c6_123 = arith.constant 6 : index
    %c0_124 = arith.constant 0 : index
    %c0_125 = arith.constant 0 : index
    %167 = vector.load %arg1[%c6_123, %c0_124, %c0_125] : memref<12x32x8xf32, #tpu.memory_space<vmem>>, vector<1x32x8xf32>
    %168 = vector.shape_cast %167 : vector<1x32x8xf32> to vector<32x8xf32>
    %cst_126 = arith.constant dense<0.000000e+00> : vector<8x8xf32>
    %169 = tpu.matmul %110, %168, %cst_126 {dimension_numbers = #tpu.dot_dimension_numbers<[1], [0], [0], [1], [0, 0, 1, 1], [], []>} : vector<8x32xf32>, vector<32x8xf32>, vector<8x8xf32> -> vector<8x8xf32>
    %c10_127 = arith.constant 10 : index
    %c0_128 = arith.constant 0 : index
    %c0_129 = arith.constant 0 : index
    %170 = vector.load %arg1[%c10_127, %c0_128, %c0_129] : memref<12x32x8xf32, #tpu.memory_space<vmem>>, vector<1x32x8xf32>
    %171 = vector.shape_cast %170 : vector<1x32x8xf32> to vector<32x8xf32>
    %cst_130 = arith.constant dense<0.000000e+00> : vector<8x8xf32>
    %172 = tpu.matmul %110, %171, %cst_130 {dimension_numbers = #tpu.dot_dimension_numbers<[1], [0], [0], [1], [0, 0, 1, 1], [], []>} : vector<8x32xf32>, vector<32x8xf32>, vector<8x8xf32> -> vector<8x8xf32>
    %cst_131 = arith.constant dense<0.000000e+00> : vector<8x8xf32>
    %173 = tpu.matmul %166, %169, %cst_131 {dimension_numbers = #tpu.dot_dimension_numbers<[1], [1], [0], [0], [0, 0, 1, 0], [], []>} : vector<8x8xf32>, vector<8x8xf32>, vector<8x8xf32> -> vector<8x8xf32>
    %cst_132 = arith.constant dense<0xFF800000> : vector<8xf32>
    %174 = vector.multi_reduction <maximumf>, %173, %cst_132 [1] : vector<8x8xf32> to vector<8xf32>
    %175 = vector.shape_cast %174 : vector<8xf32> to vector<8x1xf32>
    %176 = vector.broadcast %175 : vector<8x1xf32> to vector<8x8xf32>
    %177 = arith.subf %173, %176 : vector<8x8xf32>
    %178 = math.exp %177 : vector<8x8xf32>
    %cst_133 = arith.constant dense<0.000000e+00> : vector<8xf32>
    %179 = vector.multi_reduction <add>, %178, %cst_133 [1] : vector<8x8xf32> to vector<8xf32>
    %180 = vector.shape_cast %179 : vector<8xf32> to vector<8x1xf32>
    %181 = vector.broadcast %180 : vector<8x1xf32> to vector<8x8xf32>
    %182 = arith.divf %178, %181 : vector<8x8xf32>
    %cst_134 = arith.constant dense<0.000000e+00> : vector<8x8xf32>
    %183 = tpu.matmul %182, %172, %cst_134 {dimension_numbers = #tpu.dot_dimension_numbers<[1], [0], [0], [1], [0, 0, 1, 1], [], []>} : vector<8x8xf32>, vector<8x8xf32>, vector<8x8xf32> -> vector<8x8xf32>
    %c16_135 = arith.constant 16 : index
    %c0_136 = arith.constant 0 : index
    %184 = vector.load %arg2[%c16_135, %c0_136] : memref<32x32xf32, #tpu.memory_space<vmem>>, vector<8x32xf32>
    %cst_137 = arith.constant dense<0.000000e+00> : vector<8x32xf32>
    %185 = tpu.matmul %183, %184, %cst_137 {dimension_numbers = #tpu.dot_dimension_numbers<[1], [0], [0], [1], [0, 0, 1, 1], [], []>} : vector<8x8xf32>, vector<8x32xf32>, vector<8x32xf32> -> vector<8x32xf32>
    %186 = arith.addf %161, %185 : vector<8x32xf32>
    %c3_138 = arith.constant 3 : index
    %c0_139 = arith.constant 0 : index
    %c0_140 = arith.constant 0 : index
    %187 = vector.load %arg1[%c3_138, %c0_139, %c0_140] : memref<12x32x8xf32, #tpu.memory_space<vmem>>, vector<1x32x8xf32>
    %188 = vector.shape_cast %187 : vector<1x32x8xf32> to vector<32x8xf32>
    %cst_141 = arith.constant dense<0.000000e+00> : vector<8x8xf32>
    %189 = tpu.matmul %110, %188, %cst_141 {dimension_numbers = #tpu.dot_dimension_numbers<[1], [0], [0], [1], [0, 0, 1, 1], [], []>} : vector<8x32xf32>, vector<32x8xf32>, vector<8x8xf32> -> vector<8x8xf32>
    %cst_142 = arith.constant 0.176776692 : f32
    %190 = vector.broadcast %cst_142 : f32 to vector<8x8xf32>
    %191 = arith.mulf %189, %190 : vector<8x8xf32>
    %c7_143 = arith.constant 7 : index
    %c0_144 = arith.constant 0 : index
    %c0_145 = arith.constant 0 : index
    %192 = vector.load %arg1[%c7_143, %c0_144, %c0_145] : memref<12x32x8xf32, #tpu.memory_space<vmem>>, vector<1x32x8xf32>
    %193 = vector.shape_cast %192 : vector<1x32x8xf32> to vector<32x8xf32>
    %cst_146 = arith.constant dense<0.000000e+00> : vector<8x8xf32>
    %194 = tpu.matmul %110, %193, %cst_146 {dimension_numbers = #tpu.dot_dimension_numbers<[1], [0], [0], [1], [0, 0, 1, 1], [], []>} : vector<8x32xf32>, vector<32x8xf32>, vector<8x8xf32> -> vector<8x8xf32>
    %c11_147 = arith.constant 11 : index
    %c0_148 = arith.constant 0 : index
    %c0_149 = arith.constant 0 : index
    %195 = vector.load %arg1[%c11_147, %c0_148, %c0_149] : memref<12x32x8xf32, #tpu.memory_space<vmem>>, vector<1x32x8xf32>
    %196 = vector.shape_cast %195 : vector<1x32x8xf32> to vector<32x8xf32>
    %cst_150 = arith.constant dense<0.000000e+00> : vector<8x8xf32>
    %197 = tpu.matmul %110, %196, %cst_150 {dimension_numbers = #tpu.dot_dimension_numbers<[1], [0], [0], [1], [0, 0, 1, 1], [], []>} : vector<8x32xf32>, vector<32x8xf32>, vector<8x8xf32> -> vector<8x8xf32>
    %cst_151 = arith.constant dense<0.000000e+00> : vector<8x8xf32>
    %198 = tpu.matmul %191, %194, %cst_151 {dimension_numbers = #tpu.dot_dimension_numbers<[1], [1], [0], [0], [0, 0, 1, 0], [], []>} : vector<8x8xf32>, vector<8x8xf32>, vector<8x8xf32> -> vector<8x8xf32>
    %cst_152 = arith.constant dense<0xFF800000> : vector<8xf32>
    %199 = vector.multi_reduction <maximumf>, %198, %cst_152 [1] : vector<8x8xf32> to vector<8xf32>
    %200 = vector.shape_cast %199 : vector<8xf32> to vector<8x1xf32>
    %201 = vector.broadcast %200 : vector<8x1xf32> to vector<8x8xf32>
    %202 = arith.subf %198, %201 : vector<8x8xf32>
    %203 = math.exp %202 : vector<8x8xf32>
    %cst_153 = arith.constant dense<0.000000e+00> : vector<8xf32>
    %204 = vector.multi_reduction <add>, %203, %cst_153 [1] : vector<8x8xf32> to vector<8xf32>
    %205 = vector.shape_cast %204 : vector<8xf32> to vector<8x1xf32>
    %206 = vector.broadcast %205 : vector<8x1xf32> to vector<8x8xf32>
    %207 = arith.divf %203, %206 : vector<8x8xf32>
    %cst_154 = arith.constant dense<0.000000e+00> : vector<8x8xf32>
    %208 = tpu.matmul %207, %197, %cst_154 {dimension_numbers = #tpu.dot_dimension_numbers<[1], [0], [0], [1], [0, 0, 1, 1], [], []>} : vector<8x8xf32>, vector<8x8xf32>, vector<8x8xf32> -> vector<8x8xf32>
    %c24_155 = arith.constant 24 : index
    %c0_156 = arith.constant 0 : index
    %209 = vector.load %arg2[%c24_155, %c0_156] : memref<32x32xf32, #tpu.memory_space<vmem>>, vector<8x32xf32>
    %cst_157 = arith.constant dense<0.000000e+00> : vector<8x32xf32>
    %210 = tpu.matmul %208, %209, %cst_157 {dimension_numbers = #tpu.dot_dimension_numbers<[1], [0], [0], [1], [0, 0, 1, 1], [], []>} : vector<8x8xf32>, vector<8x32xf32>, vector<8x32xf32> -> vector<8x32xf32>
    %211 = arith.addf %186, %210 : vector<8x32xf32>
    %212 = vector.broadcast %0 : vector<1x32xf32> to vector<8x32xf32>
    %213 = arith.addf %211, %212 : vector<8x32xf32>
    %c1_158 = arith.constant 1 : index
    %c0_159 = arith.constant 0 : index
    %c0_160 = arith.constant 0 : index
    %214 = vector.load %arg4[%c1_158, %c0_159, %c0_160] : memref<2x8x32xf32, #tpu.memory_space<vmem>>, vector<1x8x32xf32>
    %215 = vector.shape_cast %214 : vector<1x8x32xf32> to vector<8x32xf32>
    %216 = vector.shape_cast %213 : vector<8x32xf32> to vector<1x8x32xf32>
    tpu.vector_store %arg4[%c1_158, %c0_159, %c0_160], %216 {strides = array<i32>} : memref<2x8x32xf32, #tpu.memory_space<vmem>>, vector<1x8x32xf32>,
    return
  }
}

</mosaic_0001>

<bundles_post_ra>
// kernel: tpu_custom_call.1
= control target key start
LH: loop header
LB: loop body
LE: loop exit
PB: predicated region body
PF: predicated region fallthrough
CT: control target
= control target key end

     0   :  { %v4632_v3 = vmov 0.0|0.0   ;;  %vm4633_vm0 = vmmov 0   ;;  %v4634_v11 = vmov 0.0   ;;  %s5232_s0 = inlined_call_operand.vmem [shape: f32[2,8,32], index: 0, kind: input, shape index: {}]   ;;  %s5233_s1 = inlined_call_operand.vmem [shape: f32[12,32,8], index: 1, kind: input, shape index: {}]   ;;  %s5234_s2 = inlined_call_operand.vmem [shape: f32[32,32], index: 2, kind: input, shape index: {}]   ;;  %s5235_s3 = inlined_call_operand.vmem [shape: f32[1,32], index: 3, kind: input, shape index: {}]   ;;  %s5236_s4 = inlined_call_operand.hbm [shape: f32[2,8,32], index: 4, kind: output, shape index: {}]  }
   0x1   :  { %v20_v0 = vld [vmem:[%s5233_s1] sm:$0xff]  ;;  %v21_v1 = vld [vmem:[%s5233_s1 + $0x8] sm:$0xff]  ;;  %4426 = vmatprep.subr.bf16.mxu0 %v4632_v3  ;;  %4432 = vmatprep.subr.bf16.mxu1 %v4632_v3  ;;  %v22_v6 = vld [vmem:[%s5233_s1 + $0x10] sm:$0xff] }
   0x2   :  { %v3729_v2 = vld [vmem:[%s5233_s1 + $0x80] sm:$0xff]  ;;  %v4674_v4 = vpack.c.bf16 %v21_v1, %v20_v0  ;;  %v3730_v5 = vld [vmem:[%s5233_s1 + $0x88] sm:$0xff]  ;;  %v23_v7 = vld [vmem:[%s5233_s1 + $0x18] sm:$0xff]  ;;  %4050 = vmatprep.mubr.msk.f32.mxu0 %vm4633_vm0, %v4634_v11  ;;  %4061 = vmatprep.mubr.msk.f32.mxu1 %vm4633_vm0, %v4634_v11 }
   0x3   :  { %v4685_v8 = vpack.c.bf16 %v3730_v5, %v3729_v2  ;;  %v3731_v9 = vld [vmem:[%s5233_s1 + $0x90] sm:$0xff]  ;;  %v3732_v10 = vld [vmem:[%s5233_s1 + $0x98] sm:$0xff]  ;;  %v4698_v12 = vpack.c.bf16 %v23_v7, %v22_v6 }
   0x4   :  { %4428 = vmatpush3.bf16.msra.mxu0 %v4674_v4 }
   0x5   :  { %9 = vsyncpa [#allocation3], 0  ;;  %4434 = vmatpush3.bf16.msra.mxu1 %v4685_v8  ;;  %4429 = vmatprep.subr.bf16.mxu0 %v4632_v3  ;;  %v4702_v13 = vpack.c.bf16 %v3732_v10, %v3731_v9  ;;  %v4709_v14 = vld [vmem:[%s5232_s0] sm:$0xff]  ;;  %vm24_vm1 = vcmask 261120   ;;  %vm249_vm2 = vcmask 64512   ;;  %v3735_v21 = vld [vmem:[%s5233_s1 + $0x108] sm:$0xff] }
   0x6   :  { %4435 = vmatprep.subr.bf16.mxu1 %v4632_v3  ;;  %v3734_v20 = vld [vmem:[%s5233_s1 + $0x100] sm:$0xff]  ;;  %v3736_v22 = vld [vmem:[%s5233_s1 + $0x110] sm:$0xff]  ;;  %v3737_v24 = vld [vmem:[%s5233_s1 + $0x118] sm:$0xff] }
   0x7   :  { %v4736_v23 = vpack.c.bf16 %v3735_v21, %v3734_v20  ;;  %v4742_v25 = vpack.c.bf16 %v3737_v24, %v3736_v22  ;;  %v3742_v36 = vld [vmem:[%s5233_s1 + $0x20] sm:$0xff]  ;;  %v3743_v37 = vld [vmem:[%s5233_s1 + $0x28] sm:$0xff]  ;;  %v3744_v39 = vld [vmem:[%s5233_s1 + $0x30] sm:$0xff] }
   0x8   :  { %4431 = vmatpush3.bf16.msra.mxu0 %v4698_v12  ;;  %v4760_v38 = vpack.c.bf16 %v3743_v37, %v3742_v36  ;;  %v3745_v40 = vld [vmem:[%s5233_s1 + $0x38] sm:$0xff]  ;;  %v3747_v43 = vld [vmem:[%s5233_s1 + $0xa0] sm:$0xff]  ;;  %v3748_v44 = vld [vmem:[%s5233_s1 + $0xa8] sm:$0xff] }
   0x9   :  { %4437 = vmatpush3.bf16.msra.mxu1 %v4702_v13  ;;  %4438 = vmatprep.subr.bf16.mxu0 %v4632_v3  ;;  %v4770_v41 = vpack.c.bf16 %v3745_v40, %v3744_v39  ;;  %v4784_v46 = vpack.c.bf16 %v3748_v44, %v3747_v43  ;;  %v3749_v48 = vld [vmem:[%s5233_s1 + $0xb0] sm:$0xff]  ;;  %v3750_v49 = vld [vmem:[%s5233_s1 + $0xb8] sm:$0xff]  ;;  %v3752_v58 = vld [vmem:[%s5233_s1 + $0x120] sm:$0xff] }
   0xa   :  { %4075 = vmatprep.subr.mxu1 %v4634_v11  ;;  %v4794_v50 = vpack.c.bf16 %v3750_v49, %v3749_v48  ;;  %v3753_v59 = vld [vmem:[%s5233_s1 + $0x128] sm:$0xff]  ;;  %v3754_v60 = vld [vmem:[%s5233_s1 + $0x130] sm:$0xff]  ;;  %v3755_v62 = vld [vmem:[%s5233_s1 + $0x138] sm:$0xff] }
   0xb   :  { %4051 = vmatmul.mubr.msk.f32.vlgmr.msra.gmra.mrb[0].mxu0 %vm24_vm1, %v4709_v14  ;;  %v4819_v61 = vpack.c.bf16 %v3753_v59, %v3752_v58  ;;  %v4825_v63 = vpack.c.bf16 %v3755_v62, %v3754_v60  ;;  %v4847_v21 = vld [vmem:[%s5234_s2] sm:$0xff]  ;;  %v3768_v24 = vld [vmem:[%s5233_s1 + $0xc8] sm:$0xff] }
   0xc   :  { %4062 = vmatmul.mubr.msk.f32.vlgmr.msra.gmra.mrb[0].mxu1 %vm24_vm1, %v4709_v14  ;;  %4072 = vmatprep.mubr.msk.f32.mxu0 %vm4633_vm0, %v4634_v11  ;;  %v3767_v22 = vld [vmem:[%s5233_s1 + $0xc0] sm:$0xff] }
   0xd   :  { %4077 = vmatprep.mubr.msk.f32.mxu1 %vm4633_vm0, %v4634_v11  ;;  %4440 = vmatpush3.bf16.msra.mxu0 %v4736_v23 }
   0xe   :  { %4441 = vmatprep.subr.bf16.mxu0 %v4632_v3 }
  0x11   :  { %4443 = vmatpush3.bf16.msra.mxu0 %v4742_v25 }
  0x12   :  { %4444 = vmatprep.subr.bf16.mxu0 %v4632_v3 }
  0x14   :  { %4073 = vmatmul.mubr.msk.f32.vlgmr.msra.gmra.mrb[2].mxu0 %vm24_vm1, %v4709_v14 }
  0x15   :  { %4093 = vmatprep.mubr.msk.f32.mxu0 %vm4633_vm0, %v4634_v11  ;;  %4446 = vmatpush3.bf16.msra.mxu0 %v4760_v38 }
  0x16   :  { %4447 = vmatprep.subr.bf16.mxu0 %v4632_v3 }
  0x19   :  { %4449 = vmatpush3.bf16.msra.mxu0 %v4770_v41 }
  0x1a   :  { %4456 = vmatprep.subr.bf16.mxu0 %v4632_v3 }
  0x1c   :  { %4094 = vmatmul.mubr.msk.f32.vlgmr.msra.gmra.mrb[4].mxu0 %vm24_vm1, %v4709_v14 }
  0x1d   :  { %4115 = vmatprep.mubr.msk.f32.mxu0 %vm4633_vm0, %v4634_v11  ;;  %4458 = vmatpush3.bf16.msra.mxu0 %v4819_v61 }
  0x1e   :  { %4459 = vmatprep.subr.bf16.mxu0 %v4632_v3 }
  0x21   :  { %4461 = vmatpush3.bf16.msra.mxu0 %v4825_v63 }
  0x22   :  { %4128 = vmatprep.subr.mxu0 %v4634_v11 }
  0x24   :  { %4116 = vmatmul.mubr.msk.f32.vlgmr.msra.gmra.mrb[6].mxu0 %vm24_vm1, %v4709_v14 }
  0x25   :  { %4130 = vmatprep.mubr.msk.f32.mxu0 %vm4633_vm0, %v4634_v11 }
  0xde   :  { %v94_v15 = vpop.f32.mrb[0].mxu0 }
  0xdf   :  { %v98_v16 = vmul.f32 0.17677669, %v94_v15  ;;  %v170_v17 = vpop.f32.mrb[0].mxu1  ;;  %v4052_v18 = vpop.f32.mrb[1].mxu0 }
  0xe0   :  { %v4063_v19 = vpop.f32.mrb[1].mxu1  ;;  %4076 = vmatpush3.xpose.msk.msra.mxu1 %vm249_vm2, %v170_v17  ;;  %v4840_v17 = vld [vmem:[%s5234_s2 + $0x8] sm:$0xff] }
  0xe1   :  { %4080 = vmatprep.subr.mxu1 %v4634_v11  ;;  %4129 = vmatpush3.msra.mxu0 %v4840_v17 }
  0xe2   :  { %4462 = vmatprep.subr.bf16.mxu0 %v4632_v3 }
  0xe3   :  { %4078 = vmatmul.mubr.msk.f32.vlgmr.msra.gmra.mrb[2].mxu1 %vm249_vm2, %v98_v16 }
  0xe4   :  { %4082 = vmatprep.mubr.msk.f32.mxu1 %vm4633_vm0, %v4634_v11 }
  0xe7   :  { %v245_v34 = vpop.f32.mrb[2].mxu0 }
  0xe8   :  { %v4074_v35 = vpop.f32.mrb[3].mxu0  ;;  %4081 = vmatpush3.msra.mxu1 %v245_v34  ;;  %v3765_v34 = vld [vmem:[%s5233_s1 + $0x58] sm:$0xff] }
  0xe9   :  { %4450 = vmatprep.subr.bf16.mxu1 %v4632_v3 }
  0xef   :  { %v482_v51 = vpop.f32.mrb[4].mxu0 }
  0xf0   :  { %v4095_v52 = vpop.f32.mrb[5].mxu0  ;;  %v486_v55 = vmul.f32 0.17677669, %v482_v51 }
  0xf1   :  { %v3772_v52 = vld [vmem:[%s5233_s1 + $0x140] sm:$0xff] }
  0xf7   :  { %v633_v15 = vpop.f32.mrb[6].mxu0 }
  0xf8   :  { %v4117_v16 = vpop.f32.mrb[7].mxu0 }
 0x1b6   :  { %v322_v26 = vpop.f32.mrb[2].mxu1 }
 0x1b7   :  { %v4079_v27 = vpop.f32.mrb[3].mxu1  ;;  %v326_v28 = vsel %vm249_vm2, %v322_v26, -inf }
 0x1b8   :  { %327 = vmax.xlane.f32.xlu0 %v326_v28  ;;  %v3769_v27 = vld [vmem:[%s5233_s1 + $0xd0] sm:$0xff]  ;;  %v3770_v28 = vld [vmem:[%s5233_s1 + $0xd8] sm:$0xff] }
 0x245   :  { %v328_v29 = vpop.xlane.xlu0 %327 }
 0x246   :  { %v329_v30 = vsub.f32 %v322_v26, %v328_v29  ;;  %v4859_v26 = vpack.c.bf16 %v3768_v24, %v3767_v22  ;;  %v4873_v29 = vpack.c.bf16 %v3770_v28, %v3769_v27  ;;  %v3783_v22 = vld [vmem:[%s5233_s1 + $0x70] sm:$0xff]  ;;  %v3784_v24 = vld [vmem:[%s5233_s1 + $0x78] sm:$0xff]  ;;  %v3786_v28 = vld [vmem:[%s5233_s1 + $0xe0] sm:$0xff] }
 0x247   :  { %v4968_v27 = vpack.c.bf16 %v3784_v24, %v3783_v22 }
 0x248   :  { %v330_v31 = vmul.f32 1.442695, %v329_v30  ;;  %v3762_v30 = vld [vmem:[%s5233_s1 + $0x40] sm:$0xff] }
 0x24a   :  { %4576 = vpow2.f32 %v330_v31  ;;  %v3763_v31 = vld [vmem:[%s5233_s1 + $0x48] sm:$0xff] }
 0x254   :  { %v4577_v32 = vpop.eup %4576 }
 0x255   :  { %v332_v33 = vsel %vm249_vm2, %v4577_v32, 0.0 }
 0x256   :  { %333 = vadd.xlane.f32.xlu0 %v332_v33  ;;  %v3764_v33 = vld [vmem:[%s5233_s1 + $0x50] sm:$0xff] }
 0x257   :  { %v4897_v37 = vpack.c.bf16 %v3765_v34, %v3764_v33  ;;  %v3788_v33 = vld [vmem:[%s5233_s1 + $0xf0] sm:$0xff]  ;;  %v3789_v34 = vld [vmem:[%s5233_s1 + $0xf8] sm:$0xff] }
 0x2e3   :  { %v334_v42 = vpop.xlane.xlu0 %333 }
 0x2e4   :  { %4578 = vrcp.f32 %v334_v42 }
 0x2ee   :  { %v4579_v45 = vpop.eup %4578 }
 0x2ef   :  { %v336_v47 = vmul.f32 %v4579_v45, %v4577_v32  ;;  %v4887_v32 = vpack.c.bf16 %v3763_v31, %v3762_v30  ;;  %v3787_v30 = vld [vmem:[%s5233_s1 + $0xe8] sm:$0xff] }
 0x2f0   :  { %v4982_v31 = vpack.c.bf16 %v3787_v30, %v3786_v28 }
 0x2f1   :  { %4083 = vmatmul.mubr.msk.f32.vlgmr.msra.gmra.mrb[4].mxu1 %vm249_vm2, %v336_v47 }
 0x2f2   :  { %4452 = vmatpush3.bf16.msra.mxu1 %v4784_v46  ;;  %4104 = vmatprep.mubr.msk.f32.mxu1 %vm4633_vm0, %v4634_v11 }
 0x2f3   :  { %4453 = vmatprep.subr.bf16.mxu1 %v4632_v3 }
 0x2f6   :  { %4455 = vmatpush3.bf16.msra.mxu1 %v4794_v50 }
 0x2f7   :  { %4118 = vmatprep.subr.mxu1 %v4634_v11 }
 0x2f9   :  { %4105 = vmatmul.mubr.msk.f32.vlgmr.msra.gmra.mrb[6].mxu1 %vm24_vm1, %v4709_v14 }
 0x2fa   :  { %4120 = vmatprep.mubr.msk.f32.mxu1 %vm4633_vm0, %v4634_v11 }
 0x3c4   :  { %v406_v53 = vpop.f32.mrb[4].mxu1 }
 0x3c5   :  { %v4084_v54 = vpop.f32.mrb[5].mxu1 }
 0x3c6   :  { %v3774_v54 = vld [vmem:[%s5233_s1 + $0x150] sm:$0xff] }
 0x3cc   :  { %v558_v56 = vpop.f32.mrb[6].mxu1 }
 0x3cd   :  { %v4106_v57 = vpop.f32.mrb[7].mxu1  ;;  %4119 = vmatpush3.xpose.msk.msra.mxu1 %vm249_vm2, %v558_v56  ;;  %v3775_v56 = vld [vmem:[%s5233_s1 + $0x158] sm:$0xff] }
 0x3ce   :  { %4123 = vmatprep.subr.mxu1 %v4634_v11  ;;  %v4930_v57 = vpack.c.bf16 %v3775_v56, %v3774_v54  ;;  %v3794_v56 = vld [vmem:[%s5233_s1 + $0x178] sm:$0xff] }
 0x3d0   :  { %4121 = vmatmul.mubr.msk.f32.vlgmr.msra.gmra.mrb[8].mxu1 %vm249_vm2, %v486_v55 }
 0x3d1   :  { %4125 = vmatprep.mubr.msk.f32.mxu1 %vm4633_vm0, %v4634_v11  ;;  %4124 = vmatpush3.msra.mxu1 %v633_v15 }
 0x3d2   :  { %4133 = vmatprep.subr.mxu1 %v4634_v11 }
 0x4a3   :  { %v709_v0 = vpop.f32.mrb[8].mxu1 }
 0x4a4   :  { %v4122_v1 = vpop.f32.mrb[9].mxu1  ;;  %v713_v2 = vsel %vm249_vm2, %v709_v0, -inf }
 0x4a5   :  { %714 = vmax.xlane.f32.xlu1 %v713_v2 }
 0x532   :  { %v715_v5 = vpop.xlane.xlu1 %714 }
 0x533   :  { %v716_v6 = vsub.f32 %v709_v0, %v715_v5 }
 0x535   :  { %v717_v7 = vmul.f32 1.442695, %v716_v6 }
 0x537   :  { %4580 = vpow2.f32 %v717_v7 }
 0x541   :  { %v4581_v9 = vpop.eup %4580 }
 0x542   :  { %v719_v10 = vsel %vm249_vm2, %v4581_v9, 0.0 }
 0x543   :  { %720 = vadd.xlane.f32.xlu1 %v719_v10 }
 0x5d0   :  { %v721_v18 = vpop.xlane.xlu1 %720 }
 0x5d1   :  { %4582 = vrcp.f32 %v721_v18  ;;  %v3781_v18 = vld [vmem:[%s5233_s1 + $0x60] sm:$0xff] }
 0x5db   :  { %v4583_v19 = vpop.eup %4582 }
 0x5dc   :  { %v723_v20 = vmul.f32 %v4583_v19, %v4581_v9  ;;  %v4945_v9 = vld [vmem:[%s5234_s2 + $0x10] sm:$0xff]  ;;  %v3782_v19 = vld [vmem:[%s5233_s1 + $0x68] sm:$0xff] }
 0x5de   :  { %4126 = vmatmul.mubr.msk.f32.vlgmr.msra.gmra.mrb[10].mxu1 %vm249_vm2, %v723_v20  ;;  %v4958_v20 = vpack.c.bf16 %v3782_v19, %v3781_v18  ;;  %v5055_v19 = vld [vmem:[%s5232_s0 + $0x8] sm:$0xff] }
 0x5df   :  { %4134 = vmatpush3.msra.mxu1 %v4847_v21  ;;  %4135 = vmatprep.mubr.msk.f32.mxu1 %vm4633_vm0, %v4634_v11 }
 0x5e0   :  { %4468 = vmatprep.subr.bf16.mxu1 %v4632_v3 }
 0x5e2   :  { %4136 = vmatmul.mubr.msk.f32.vlgmr.msra.gmra.mrb[12].mxu1 %vm249_vm2, %v406_v53  ;;  %v3773_v53 = vld [vmem:[%s5233_s1 + $0x148] sm:$0xff] }
 0x5e3   :  { %4470 = vmatpush3.bf16.msra.mxu1 %v4859_v26  ;;  %4157 = vmatprep.mubr.msk.f32.mxu1 %vm4633_vm0, %v4634_v11  ;;  %v4924_v55 = vpack.c.bf16 %v3773_v53, %v3772_v52  ;;  %v3791_v52 = vld [vmem:[%s5233_s1 + $0x160] sm:$0xff]  ;;  %v3793_v53 = vld [vmem:[%s5233_s1 + $0x170] sm:$0xff] }
 0x5e4   :  { %4471 = vmatprep.subr.bf16.mxu1 %v4632_v3 }
 0x5e7   :  { %4473 = vmatpush3.bf16.msra.mxu1 %v4873_v29 }
 0x5e8   :  { %4171 = vmatprep.subr.mxu1 %v4634_v11 }
 0x5ea   :  { %4158 = vmatmul.mubr.msk.f32.vlgmr.msra.gmra.mrb[14].mxu1 %vm24_vm1, %v4709_v14 }
 0x5eb   :  { %4173 = vmatprep.mubr.msk.f32.mxu1 %vm4633_vm0, %v4634_v11 }
 0x6b1   :  { %v793_v35 = vpop.f32.mrb[10].mxu1 }
 0x6b2   :  { %v4127_v36 = vpop.f32.mrb[11].mxu1  ;;  %4131 = vmatmul.mubr.msk.f32.vlgmr.msra.gmra.mrb[8].mxu0 %vm249_vm2, %v793_v35 }
 0x6b3   :  { %4464 = vmatpush3.bf16.msra.mxu0 %v4887_v32  ;;  %4146 = vmatprep.mubr.msk.f32.mxu0 %vm4633_vm0, %v4634_v11 }
 0x6b4   :  { %4465 = vmatprep.subr.bf16.mxu0 %v4632_v3 }
 0x6b5   :  { %v940_v39 = vpop.f32.mrb[12].mxu1 }
 0x6b6   :  { %v4137_v40 = vpop.f32.mrb[13].mxu1 }
 0x6b7   :  { %4467 = vmatpush3.bf16.msra.mxu0 %v4897_v37 }
 0x6b8   :  { %4474 = vmatprep.subr.bf16.mxu0 %v4632_v3 }
 0x6ba   :  { %4147 = vmatmul.mubr.msk.f32.vlgmr.msra.gmra.mrb[10].mxu0 %vm24_vm1, %v4709_v14 }
 0x6bb   :  { %4168 = vmatprep.mubr.msk.f32.mxu0 %vm4633_vm0, %v4634_v11  ;;  %4476 = vmatpush3.bf16.msra.mxu0 %v4924_v55 }
 0x6bc   :  { %4477 = vmatprep.subr.bf16.mxu0 %v4632_v3 }
 0x6bd   :  { %v1091_v42 = vpop.f32.mrb[14].mxu1 }
 0x6be   :  { %v4159_v43 = vpop.f32.mrb[15].mxu1  ;;  %4172 = vmatpush3.xpose.msk.msra.mxu1 %vm249_vm2, %v1091_v42 }
 0x6bf   :  { %4176 = vmatprep.subr.mxu1 %v4634_v11  ;;  %4479 = vmatpush3.bf16.msra.mxu0 %v4930_v57 }
 0x6c0   :  { %4181 = vmatprep.subr.mxu0 %v4634_v11 }
 0x6c2   :  { %4169 = vmatmul.mubr.msk.f32.vlgmr.msra.gmra.mrb[12].mxu0 %vm24_vm1, %v4709_v14 }
 0x6c3   :  { %4183 = vmatprep.mubr.msk.f32.mxu0 %vm4633_vm0, %v4634_v11  ;;  %4182 = vmatpush3.msra.mxu0 %v4945_v9 }
 0x6c4   :  { %4486 = vmatprep.subr.bf16.mxu0 %v4632_v3 }
 0x785   :  { %v867_v44 = vpop.f32.mrb[8].mxu0 }
 0x786   :  { %v4910_v45 = vadd.f32 %v940_v39, %v867_v44  ;;  %v4132_v47 = vpop.f32.mrb[9].mxu0  ;;  %v4992_v39 = vpack.c.bf16 %v3789_v34, %v3788_v33 }
 0x78d   :  { %v1015_v48 = vpop.f32.mrb[10].mxu0 }
 0x78e   :  { %v1019_v49 = vmul.f32 0.17677669, %v1015_v48  ;;  %v4148_v51 = vpop.f32.mrb[11].mxu0 }
 0x790   :  { %4174 = vmatmul.mubr.msk.f32.vlgmr.msra.gmra.mrb[16].mxu1 %vm249_vm2, %v1019_v49 }
 0x791   :  { %4178 = vmatprep.mubr.msk.f32.mxu1 %vm4633_vm0, %v4634_v11 }
 0x795   :  { %v1166_v6 = vpop.f32.mrb[12].mxu0 }
 0x796   :  { %v4170_v7 = vpop.f32.mrb[13].mxu0  ;;  %4177 = vmatpush3.msra.mxu1 %v1166_v6 }
 0x797   :  { %4480 = vmatprep.subr.bf16.mxu1 %v4632_v3 }
 0x863   :  { %v1242_v58 = vpop.f32.mrb[16].mxu1 }
 0x864   :  { %v4175_v59 = vpop.f32.mrb[17].mxu1  ;;  %v1246_v60 = vsel %vm249_vm2, %v1242_v58, -inf }
 0x865   :  { %1247 = vmax.xlane.f32.xlu0 %v1246_v60 }
 0x8f2   :  { %v1248_v62 = vpop.xlane.xlu0 %1247 }
 0x8f3   :  { %v1249_v0 = vsub.f32 %v1242_v58, %v1248_v62  ;;  %v5026_v58 = vpack.c.bf16 %v3794_v56, %v3793_v53 }
 0x8f5   :  { %v1250_v1 = vmul.f32 1.442695, %v1249_v0 }
 0x8f7   :  { %4584 = vpow2.f32 %v1250_v1 }
 0x901   :  { %v4585_v2 = vpop.eup %4584 }
 0x902   :  { %v1252_v5 = vsel %vm249_vm2, %v4585_v2, 0.0 }
 0x903   :  { %1253 = vadd.xlane.f32.xlu1 %v1252_v5 }
 0x990   :  { %v1254_v10 = vpop.xlane.xlu1 %1253 }
 0x991   :  { %4586 = vrcp.f32 %v1254_v10 }
 0x99b   :  { %v4587_v15 = vpop.eup %4586 }
 0x99c   :  { %v1256_v16 = vmul.f32 %v4587_v15, %v4585_v2 }
 0x99e   :  { %4179 = vmatmul.mubr.msk.f32.vlgmr.msra.gmra.mrb[18].mxu1 %vm249_vm2, %v1256_v16 }
 0x99f   :  { %4194 = vmatprep.mubr.msk.f32.mxu1 %vm4633_vm0, %v4634_v11  ;;  %4482 = vmatpush3.bf16.msra.mxu1 %v4958_v20 }
 0x9a0   :  { %4483 = vmatprep.subr.bf16.mxu1 %v4632_v3 }
 0x9a3   :  { %4485 = vmatpush3.bf16.msra.mxu1 %v4968_v27 }
 0x9a4   :  { %4492 = vmatprep.subr.bf16.mxu1 %v4632_v3 }
 0x9a6   :  { %4195 = vmatmul.mubr.msk.f32.vlgmr.msra.gmra.mrb[20].mxu1 %vm24_vm1, %v4709_v14 }
 0x9a7   :  { %4216 = vmatprep.mubr.msk.f32.mxu1 %vm4633_vm0, %v4634_v11 }
 0xa71   :  { %v1326_v35 = vpop.f32.mrb[18].mxu1 }
 0xa72   :  { %v4180_v36 = vpop.f32.mrb[19].mxu1  ;;  %4184 = vmatmul.mubr.msk.f32.vlgmr.msra.gmra.mrb[14].mxu0 %vm249_vm2, %v1326_v35 }
 0xa73   :  { %4488 = vmatpush3.bf16.msra.mxu0 %v4982_v31  ;;  %4205 = vmatprep.mubr.msk.f32.mxu0 %vm4633_vm0, %v4634_v11 }
 0xa74   :  { %4489 = vmatprep.subr.bf16.mxu0 %v4632_v3 }
 0xa77   :  { %4491 = vmatpush3.bf16.msra.mxu0 %v4992_v39 }
 0xa78   :  { %4219 = vmatprep.subr.mxu0 %v4634_v11 }
 0xa79   :  { %v1476_v40 = vpop.f32.mrb[20].mxu1 }
 0xa7a   :  { %4206 = vmatmul.mubr.msk.f32.vlgmr.msra.gmra.mrb[16].mxu0 %vm24_vm1, %v4709_v14  ;;  %v4196_v42 = vpop.f32.mrb[21].mxu1  ;;  %v1480_v48 = vmul.f32 0.17677669, %v1476_v40 }
 0xa7b   :  { %4221 = vmatprep.mubr.msk.f32.mxu0 %vm4633_vm0, %v4634_v11 }
 0xb45   :  { %v1400_v43 = vpop.f32.mrb[14].mxu0 }
 0xb46   :  { %v5004_v44 = vadd.f32 %v1400_v43, %v4910_v45  ;;  %v4185_v47 = vpop.f32.mrb[15].mxu0  ;;  %v3792_v45 = vld [vmem:[%s5233_s1 + $0x168] sm:$0xff] }
 0xb47   :  { %v5020_v54 = vpack.c.bf16 %v3792_v45, %v3791_v52 }
 0xb49   :  { %4494 = vmatpush3.bf16.msra.mxu1 %v5020_v54 }
 0xb4a   :  { %4495 = vmatprep.subr.bf16.mxu1 %v4632_v3 }
 0xb4d   :  { %v1552_v49 = vpop.f32.mrb[16].mxu0  ;;  %4497 = vmatpush3.bf16.msra.mxu1 %v5026_v58 }
 0xb4e   :  { %v4207_v51 = vpop.f32.mrb[17].mxu0  ;;  %4220 = vmatpush3.xpose.msk.msra.mxu0 %vm249_vm2, %v1552_v49  ;;  %4229 = vmatprep.subr.mxu1 %v4634_v11 }
 0xb4f   :  { %4224 = vmatprep.subr.mxu0 %v4634_v11 }
 0xb50   :  { %4217 = vmatmul.mubr.msk.f32.vlgmr.msra.gmra.mrb[22].mxu1 %vm24_vm1, %v4709_v14  ;;  %v5041_v14 = vld [vmem:[%s5234_s2 + $0x18] sm:$0xff] }
 0xb51   :  { %4222 = vmatmul.mubr.msk.f32.vlgmr.msra.gmra.mrb[18].mxu0 %vm249_vm2, %v1480_v48  ;;  %4231 = vmatprep.mubr.msk.f32.mxu1 %vm4633_vm0, %v4634_v11 }
 0xb52   :  { %4226 = vmatprep.mubr.msk.f32.mxu0 %vm4633_vm0, %v4634_v11  ;;  %4230 = vmatpush3.msra.mxu1 %v5041_v14 }
 0xb53   :  { %4504 = vmatprep.subr.bf16.mxu1 %v4632_v3 }
 0xc23   :  { %v1627_v7 = vpop.f32.mrb[22].mxu1 }
 0xc24   :  { %v1703_v59 = vpop.f32.mrb[18].mxu0  ;;  %v4218_v10 = vpop.f32.mrb[23].mxu1  ;;  %4225 = vmatpush3.msra.mxu0 %v1627_v7 }
 0xc25   :  { %v4223_v60 = vpop.f32.mrb[19].mxu0  ;;  %v1707_v62 = vsel %vm249_vm2, %v1703_v59, -inf  ;;  %4498 = vmatprep.subr.bf16.mxu0 %v4632_v3 }
 0xc26   :  { %1708 = vmax.xlane.f32.xlu0 %v1707_v62 }
 0xcb3   :  { %v1709_v0 = vpop.xlane.xlu0 %1708 }
 0xcb4   :  { %v1710_v1 = vsub.f32 %v1703_v59, %v1709_v0 }
 0xcb6   :  { %v1711_v2 = vmul.f32 1.442695, %v1710_v1 }
 0xcb8   :  { %4588 = vpow2.f32 %v1711_v2 }
 0xcc2   :  { %v4589_v5 = vpop.eup %4588 }
 0xcc3   :  { %v1713_v6 = vsel %vm249_vm2, %v4589_v5, 0.0 }
 0xcc4   :  { %1714 = vadd.xlane.f32.xlu1 %v1713_v6 }
 0xd51   :  { %v1715_v15 = vpop.xlane.xlu1 %1714 }
 0xd52   :  { %4590 = vrcp.f32 %v1715_v15 }
 0xd5c   :  { %v4591_v16 = vpop.eup %4590 }
 0xd5d   :  { %v1717_v18 = vmul.f32 %v4591_v16, %v4589_v5 }
 0xd5f   :  { %4227 = vmatmul.mubr.msk.f32.vlgmr.msra.gmra.mrb[20].mxu0 %vm249_vm2, %v1717_v18 }
 0xd60   :  { %4500 = vmatpush3.bf16.msra.mxu0 %v4674_v4  ;;  %4242 = vmatprep.mubr.msk.f32.mxu0 %vm4633_vm0, %v4634_v11 }
 0xd61   :  { %4501 = vmatprep.subr.bf16.mxu0 %v4632_v3 }
 0xd64   :  { %4503 = vmatpush3.bf16.msra.mxu0 %v4698_v12 }
 0xd65   :  { %4510 = vmatprep.subr.bf16.mxu0 %v4632_v3 }
 0xd67   :  { %4243 = vmatmul.mubr.msk.f32.vlgmr.msra.gmra.mrb[22].mxu0 %vm24_vm1, %v5055_v19 }
 0xd68   :  { %4512 = vmatpush3.bf16.msra.mxu0 %v4736_v23  ;;  %4264 = vmatprep.mubr.msk.f32.mxu0 %vm4633_vm0, %v4634_v11 }
 0xd69   :  { %4513 = vmatprep.subr.bf16.mxu0 %v4632_v3 }
 0xd6c   :  { %4515 = vmatpush3.bf16.msra.mxu0 %v4742_v25 }
 0xd6d   :  { %4516 = vmatprep.subr.bf16.mxu0 %v4632_v3 }
 0xd6f   :  { %4265 = vmatmul.mubr.msk.f32.vlgmr.msra.gmra.mrb[24].mxu0 %vm24_vm1, %v5055_v19 }
 0xd70   :  { %4518 = vmatpush3.bf16.msra.mxu0 %v4760_v38  ;;  %4285 = vmatprep.mubr.msk.f32.mxu0 %vm4633_vm0, %v4634_v11 }
 0xd71   :  { %4519 = vmatprep.subr.bf16.mxu0 %v4632_v3 }
 0xd74   :  { %4521 = vmatpush3.bf16.msra.mxu0 %v4770_v41 }
 0xd75   :  { %4528 = vmatprep.subr.bf16.mxu0 %v4632_v3 }
 0xd77   :  { %4286 = vmatmul.mubr.msk.f32.vlgmr.msra.gmra.mrb[26].mxu0 %vm24_vm1, %v5055_v19 }
 0xd78   :  { %4530 = vmatpush3.bf16.msra.mxu0 %v4819_v61  ;;  %4307 = vmatprep.mubr.msk.f32.mxu0 %vm4633_vm0, %v4634_v11 }
 0xd79   :  { %4531 = vmatprep.subr.bf16.mxu0 %v4632_v3 }
 0xd7c   :  { %4533 = vmatpush3.bf16.msra.mxu0 %v4825_v63 }
 0xd7d   :  { %4320 = vmatprep.subr.mxu0 %v4634_v11 }
 0xd7f   :  { %4308 = vmatmul.mubr.msk.f32.vlgmr.msra.gmra.mrb[28].mxu0 %vm24_vm1, %v5055_v19 }
 0xd80   :  { %4321 = vmatpush3.msra.mxu0 %v4840_v17  ;;  %4322 = vmatprep.mubr.msk.f32.mxu0 %vm4633_vm0, %v4634_v11 }
 0xd81   :  { %4534 = vmatprep.subr.bf16.mxu0 %v4632_v3 }
 0xe32   :  { %v1787_v4 = vpop.f32.mrb[20].mxu0 }
 0xe33   :  { %v4228_v12 = vpop.f32.mrb[21].mxu0  ;;  %4232 = vmatmul.mubr.msk.f32.vlgmr.msra.gmra.mrb[24].mxu1 %vm249_vm2, %v1787_v4 }
 0xe34   :  { %4506 = vmatpush3.bf16.msra.mxu1 %v4685_v8  ;;  %4253 = vmatprep.mubr.msk.f32.mxu1 %vm4633_vm0, %v4634_v11  ;;  %v5101_v8 = vld [vmem:[%s5235_s3] ss:$0 sm:$0xff]  ;;  %s4635_s3 = smov [#allocation2]  }
 0xe35   :  { %4507 = vmatprep.subr.bf16.mxu1 %v4632_v3  ;;  %s3717_s18 = sshll.u32 %s4635_s3, 4  ;;  %s3718_s18 = int_to_ptr.vmem [resolvable:$true] %s3717_s18 }
 0xe36   :  { %s4608_s19 = scalar_lea.vmem %s3718_s18, 256  ;;  %p4613_p1 = scmp.lt.s32.totalorder %s3718_s18, %s3718_s18 }
 0xe37   :  { %p4609_p0 = scmp.ne.s32.totalorder %s3718_s18, %s4608_s19  ;;  %p4614_p2 = scmp.lt.s32.totalorder %s4608_s19, %s4608_s19 }
 0xe38   :  { %4509 = vmatpush3.bf16.msra.mxu1 %v4702_v13 }
 0xe39   :  { %4267 = vmatprep.subr.mxu1 %v4634_v11  ;;  %p4615_p3 = por %p4614_p2, %p4613_p1 }
 0xe3a   :  { %v1949_v23 = vpop.f32.mrb[22].mxu0 }
 0xe3b   :  { %4254 = vmatmul.mubr.msk.f32.vlgmr.msra.gmra.mrb[26].mxu1 %vm24_vm1, %v5055_v19  ;;  %v4244_v25 = vpop.f32.mrb[23].mxu0  ;;  %v1953_v63 = vmul.f32 0.17677669, %v1949_v23  ;;  %p4616_p4 = pnand %p4615_p3, %p4609_p0 }
 0xe3c   :  { %4269 = vmatprep.mubr.msk.f32.mxu1 %vm4633_vm0, %v4634_v11 }
 0xe42   :  { %v2098_v42 = vpop.f32.mrb[24].mxu0 }
 0xe43   :  { %v4266_v43 = vpop.f32.mrb[25].mxu0 }
 0xe4a   :  { %v2333_v49 = vpop.f32.mrb[26].mxu0 }
 0xe4b   :  { %v4287_v51 = vpop.f32.mrb[27].mxu0 }
 0xe52   :  { %v2482_v6 = vpop.f32.mrb[28].mxu0 }
 0xe53   :  { %v4309_v7 = vpop.f32.mrb[29].mxu0 }
 0xf06   :  { %v1861_v38 = vpop.f32.mrb[24].mxu1 }
 0xf07   :  { %v1865_v41 = vadd.f32 %v1861_v38, %v5004_v44  ;;  %v4233_v61 = vpop.f32.mrb[25].mxu1 }
 0xf09   :  { %v1872_v13 = vadd.f32 %v5101_v8, %v1865_v41 }
 0xf0b   :  { %1873 = vst.msk [vmem:[#allocation2] sm:$0xff] %vm24_vm1, %v1872_v13 }
 0xf0e   :  { %v2024_v17 = vpop.f32.mrb[26].mxu1 }
 0xf0f   :  { %v4255_v22 = vpop.f32.mrb[27].mxu1  ;;  %4268 = vmatpush3.xpose.msk.msra.mxu1 %vm249_vm2, %v2024_v17 }
 0xf10   :  { %4272 = vmatprep.subr.mxu1 %v4634_v11 }
 0xf12   :  { %4270 = vmatmul.mubr.msk.f32.vlgmr.msra.gmra.mrb[28].mxu1 %vm249_vm2, %v1953_v63 }
 0xf13   :  { %4274 = vmatprep.mubr.msk.f32.mxu1 %vm4633_vm0, %v4634_v11  ;;  %4273 = vmatpush3.msra.mxu1 %v2098_v42 }
 0xf14   :  { %4522 = vmatprep.subr.bf16.mxu1 %v4632_v3 }
 0xfe5   :  { %v2174_v24 = vpop.f32.mrb[28].mxu1 }
 0xfe6   :  { %v4271_v28 = vpop.f32.mrb[29].mxu1  ;;  %v2178_v30 = vsel %vm249_vm2, %v2174_v24, -inf }
 0xfe7   :  { %2179 = vmax.xlane.f32.xlu0 %v2178_v30 }
0x1074   :  { %v2180_v33 = vpop.xlane.xlu0 %2179 }
0x1075   :  { %v2181_v34 = vsub.f32 %v2174_v24, %v2180_v33 }
0x1077   :  { %v2182_v35 = vmul.f32 1.442695, %v2181_v34 }
0x1079   :  { %4592 = vpow2.f32 %v2182_v35 }
0x1083   :  { %v4593_v36 = vpop.eup %4592 }
0x1084   :  { %v2184_v40 = vsel %vm249_vm2, %v4593_v36, 0.0 }
0x1085   :  { %2185 = vadd.xlane.f32.xlu1 %v2184_v40 }
0x1112   :  { %v2186_v44 = vpop.xlane.xlu1 %2185 }
0x1113   :  { %4594 = vrcp.f32 %v2186_v44 }
0x111d   :  { %v4595_v47 = vpop.eup %4594 }
0x111e   :  { %v2188_v48 = vmul.f32 %v4595_v47, %v4593_v36 }
0x1120   :  { %4275 = vmatmul.mubr.msk.f32.vlgmr.msra.gmra.mrb[30].mxu1 %vm249_vm2, %v2188_v48 }
0x1121   :  { %4524 = vmatpush3.bf16.msra.mxu1 %v4784_v46  ;;  %4296 = vmatprep.mubr.msk.f32.mxu1 %vm4633_vm0, %v4634_v11  ;;  %v2337_v46 = vmul.f32 0.17677669, %v2333_v49 }
0x1122   :  { %4525 = vmatprep.subr.bf16.mxu1 %v4632_v3 }
0x1125   :  { %4527 = vmatpush3.bf16.msra.mxu1 %v4794_v50 }
0x1126   :  { %4310 = vmatprep.subr.mxu1 %v4634_v11 }
0x1128   :  { %4297 = vmatmul.mubr.msk.f32.vlgmr.msra.gmra.mrb[32].mxu1 %vm24_vm1, %v5055_v19 }
0x1129   :  { %4312 = vmatprep.mubr.msk.f32.mxu1 %vm4633_vm0, %v4634_v11 }
0x11f3   :  { %v2258_v52 = vpop.f32.mrb[30].mxu1 }
0x11f4   :  { %v4276_v45 = vpop.f32.mrb[31].mxu1 }
0x11fb   :  { %v2408_v53 = vpop.f32.mrb[32].mxu1 }
0x11fc   :  { %v4298_v56 = vpop.f32.mrb[33].mxu1  ;;  %4311 = vmatpush3.xpose.msk.msra.mxu1 %vm249_vm2, %v2408_v53 }
0x11fd   :  { %4315 = vmatprep.subr.mxu1 %v4634_v11 }
0x11ff   :  { %4313 = vmatmul.mubr.msk.f32.vlgmr.msra.gmra.mrb[34].mxu1 %vm249_vm2, %v2337_v46 }
0x1200   :  { %4317 = vmatprep.mubr.msk.f32.mxu1 %vm4633_vm0, %v4634_v11  ;;  %4316 = vmatpush3.msra.mxu1 %v2482_v6 }
0x1201   :  { %4325 = vmatprep.subr.mxu1 %v4634_v11 }
0x12d2   :  { %v2558_v50 = vpop.f32.mrb[34].mxu1 }
0x12d3   :  { %v4314_v59 = vpop.f32.mrb[35].mxu1  ;;  %v2562_v60 = vsel %vm249_vm2, %v2558_v50, -inf }
0x12d4   :  { %2563 = vmax.xlane.f32.xlu0 %v2562_v60 }
0x1361   :  { %v2564_v62 = vpop.xlane.xlu0 %2563 }
0x1362   :  { %v2565_v0 = vsub.f32 %v2558_v50, %v2564_v62 }
0x1364   :  { %v2566_v1 = vmul.f32 1.442695, %v2565_v0 }
0x1366   :  { %4596 = vpow2.f32 %v2566_v1 }
0x1370   :  { %v4597_v2 = vpop.eup %4596 }
0x1371   :  { %v2568_v5 = vsel %vm249_vm2, %v4597_v2, 0.0 }
0x1372   :  { %2569 = vadd.xlane.f32.xlu1 %v2568_v5 }
0x13ff   :  { %v2570_v10 = vpop.xlane.xlu1 %2569 }
0x1400   :  { %4598 = vrcp.f32 %v2570_v10 }
0x140a   :  { %v4599_v15 = vpop.eup %4598 }
0x140b   :  { %v2572_v16 = vmul.f32 %v4599_v15, %v4597_v2 }
0x140d   :  { %4318 = vmatmul.mubr.msk.f32.vlgmr.msra.gmra.mrb[36].mxu1 %vm249_vm2, %v2572_v16 }
0x140e   :  { %4326 = vmatpush3.msra.mxu1 %v4847_v21  ;;  %4327 = vmatprep.mubr.msk.f32.mxu1 %vm4633_vm0, %v4634_v11 }
0x140f   :  { %4540 = vmatprep.subr.bf16.mxu1 %v4632_v3 }
0x1411   :  { %4328 = vmatmul.mubr.msk.f32.vlgmr.msra.gmra.mrb[38].mxu1 %vm249_vm2, %v2258_v52 }
0x1412   :  { %4542 = vmatpush3.bf16.msra.mxu1 %v4859_v26  ;;  %4349 = vmatprep.mubr.msk.f32.mxu1 %vm4633_vm0, %v4634_v11 }
0x1413   :  { %4543 = vmatprep.subr.bf16.mxu1 %v4632_v3 }
0x1416   :  { %4545 = vmatpush3.bf16.msra.mxu1 %v4873_v29 }
0x1417   :  { %4363 = vmatprep.subr.mxu1 %v4634_v11 }
0x1419   :  { %4350 = vmatmul.mubr.msk.f32.vlgmr.msra.gmra.mrb[40].mxu1 %vm24_vm1, %v5055_v19 }
0x141a   :  { %4365 = vmatprep.mubr.msk.f32.mxu1 %vm4633_vm0, %v4634_v11 }
0x14e0   :  { %v2642_v21 = vpop.f32.mrb[36].mxu1 }
0x14e1   :  { %v4319_v18 = vpop.f32.mrb[37].mxu1  ;;  %4323 = vmatmul.mubr.msk.f32.vlgmr.msra.gmra.mrb[30].mxu0 %vm249_vm2, %v2642_v21 }
0x14e2   :  { %4536 = vmatpush3.bf16.msra.mxu0 %v4887_v32  ;;  %4338 = vmatprep.mubr.msk.f32.mxu0 %vm4633_vm0, %v4634_v11 }
0x14e3   :  { %4537 = vmatprep.subr.bf16.mxu0 %v4632_v3 }
0x14e4   :  { %v2789_v26 = vpop.f32.mrb[38].mxu1 }
0x14e5   :  { %v4329_v29 = vpop.f32.mrb[39].mxu1 }
0x14e6   :  { %4539 = vmatpush3.bf16.msra.mxu0 %v4897_v37 }
0x14e7   :  { %4546 = vmatprep.subr.bf16.mxu0 %v4632_v3 }
0x14e9   :  { %4339 = vmatmul.mubr.msk.f32.vlgmr.msra.gmra.mrb[32].mxu0 %vm24_vm1, %v5055_v19 }
0x14ea   :  { %4548 = vmatpush3.bf16.msra.mxu0 %v4924_v55  ;;  %4360 = vmatprep.mubr.msk.f32.mxu0 %vm4633_vm0, %v4634_v11 }
0x14eb   :  { %4549 = vmatprep.subr.bf16.mxu0 %v4632_v3 }
0x14ec   :  { %v2938_v32 = vpop.f32.mrb[40].mxu1 }
0x14ed   :  { %v4351_v37 = vpop.f32.mrb[41].mxu1  ;;  %4364 = vmatpush3.xpose.msk.msra.mxu1 %vm249_vm2, %v2938_v32 }
0x14ee   :  { %4551 = vmatpush3.bf16.msra.mxu0 %v4930_v57  ;;  %4368 = vmatprep.subr.mxu1 %v4634_v11 }
0x14ef   :  { %4373 = vmatprep.subr.mxu0 %v4634_v11 }
0x14f1   :  { %4361 = vmatmul.mubr.msk.f32.vlgmr.msra.gmra.mrb[34].mxu0 %vm24_vm1, %v5055_v19 }
0x14f2   :  { %4374 = vmatpush3.msra.mxu0 %v4945_v9  ;;  %4375 = vmatprep.mubr.msk.f32.mxu0 %vm4633_vm0, %v4634_v11 }
0x14f3   :  { %4558 = vmatprep.subr.bf16.mxu0 %v4632_v3 }
0x15b4   :  { %v2716_v55 = vpop.f32.mrb[30].mxu0 }
0x15b5   :  { %v2790_v57 = vadd.f32 %v2789_v26, %v2716_v55  ;;  %v4324_v4 = vpop.f32.mrb[31].mxu0 }
0x15bc   :  { %v2863_v12 = vpop.f32.mrb[32].mxu0 }
0x15bd   :  { %v2867_v23 = vmul.f32 0.17677669, %v2863_v12  ;;  %v4340_v25 = vpop.f32.mrb[33].mxu0 }
0x15bf   :  { %4366 = vmatmul.mubr.msk.f32.vlgmr.msra.gmra.mrb[42].mxu1 %vm249_vm2, %v2867_v23 }
0x15c0   :  { %4370 = vmatprep.mubr.msk.f32.mxu1 %vm4633_vm0, %v4634_v11 }
0x15c4   :  { %v3012_v24 = vpop.f32.mrb[34].mxu0 }
0x15c5   :  { %v4362_v28 = vpop.f32.mrb[35].mxu0  ;;  %4369 = vmatpush3.msra.mxu1 %v3012_v24 }
0x15c6   :  { %4552 = vmatprep.subr.bf16.mxu1 %v4632_v3 }
0x1692   :  { %v3088_v9 = vpop.f32.mrb[42].mxu1 }
0x1693   :  { %v4367_v38 = vpop.f32.mrb[43].mxu1  ;;  %v3092_v41 = vsel %vm249_vm2, %v3088_v9, -inf }
0x1694   :  { %3093 = vmax.xlane.f32.xlu0 %v3092_v41 }
0x1721   :  { %v3094_v61 = vpop.xlane.xlu0 %3093 }
0x1722   :  { %v3095_v13 = vsub.f32 %v3088_v9, %v3094_v61 }
0x1724   :  { %v3096_v63 = vmul.f32 1.442695, %v3095_v13 }
0x1726   :  { %4600 = vpow2.f32 %v3096_v63 }
0x1730   :  { %v4601_v17 = vpop.eup %4600 }
0x1731   :  { %v3098_v22 = vsel %vm249_vm2, %v4601_v17, 0.0 }
0x1732   :  { %3099 = vadd.xlane.f32.xlu1 %v3098_v22 }
0x17bf   :  { %v3100_v30 = vpop.xlane.xlu1 %3099 }
0x17c0   :  { %4602 = vrcp.f32 %v3100_v30 }
0x17ca   :  { %v4603_v33 = vpop.eup %4602 }
0x17cb   :  { %v3102_v34 = vmul.f32 %v4603_v33, %v4601_v17 }
0x17cd   :  { %4371 = vmatmul.mubr.msk.f32.vlgmr.msra.gmra.mrb[44].mxu1 %vm249_vm2, %v3102_v34 }
0x17ce   :  { %4554 = vmatpush3.bf16.msra.mxu1 %v4958_v20  ;;  %4386 = vmatprep.mubr.msk.f32.mxu1 %vm4633_vm0, %v4634_v11 }
0x17cf   :  { %4555 = vmatprep.subr.bf16.mxu1 %v4632_v3 }
0x17d2   :  { %4557 = vmatpush3.bf16.msra.mxu1 %v4968_v27 }
0x17d3   :  { %4564 = vmatprep.subr.bf16.mxu1 %v4632_v3 }
0x17d5   :  { %4387 = vmatmul.mubr.msk.f32.vlgmr.msra.gmra.mrb[46].mxu1 %vm24_vm1, %v5055_v19 }
0x17d6   :  { %4566 = vmatpush3.bf16.msra.mxu1 %v5020_v54  ;;  %4408 = vmatprep.mubr.msk.f32.mxu1 %vm4633_vm0, %v4634_v11 }
0x17d7   :  { %4567 = vmatprep.subr.bf16.mxu1 %v4632_v3 }
0x17da   :  { %4569 = vmatpush3.bf16.msra.mxu1 %v5026_v58 }
0x17db   :  { %4421 = vmatprep.subr.mxu1 %v4634_v11 }
0x17dd   :  { %4409 = vmatmul.mubr.msk.f32.vlgmr.msra.gmra.mrb[48].mxu1 %vm24_vm1, %v5055_v19 }
0x17de   :  { %4422 = vmatpush3.msra.mxu1 %v5041_v14  ;;  %4423 = vmatprep.mubr.msk.f32.mxu1 %vm4633_vm0, %v4634_v11 }
0x18a0   :  { %v3172_v20 = vpop.f32.mrb[44].mxu1 }
0x18a1   :  { %v4372_v27 = vpop.f32.mrb[45].mxu1  ;;  %4376 = vmatmul.mubr.msk.f32.vlgmr.msra.gmra.mrb[36].mxu0 %vm249_vm2, %v3172_v20 }
0x18a2   :  { %4560 = vmatpush3.bf16.msra.mxu0 %v4982_v31  ;;  %4397 = vmatprep.mubr.msk.f32.mxu0 %vm4633_vm0, %v4634_v11 }
0x18a3   :  { %4561 = vmatprep.subr.bf16.mxu0 %v4632_v3 }
0x18a6   :  { %4563 = vmatpush3.bf16.msra.mxu0 %v4992_v39 }
0x18a7   :  { %4411 = vmatprep.subr.mxu0 %v4634_v11 }
0x18a8   :  { %v3321_v54 = vpop.f32.mrb[46].mxu1 }
0x18a9   :  { %4398 = vmatmul.mubr.msk.f32.vlgmr.msra.gmra.mrb[38].mxu0 %vm24_vm1, %v5055_v19  ;;  %v4388_v58 = vpop.f32.mrb[47].mxu1  ;;  %v3325_v40 = vmul.f32 0.17677669, %v3321_v54 }
0x18aa   :  { %4413 = vmatprep.mubr.msk.f32.mxu0 %vm4633_vm0, %v4634_v11 }
0x18b0   :  { %v3470_v51 = vpop.f32.mrb[48].mxu1 }
0x18b1   :  { %v4410_v52 = vpop.f32.mrb[49].mxu1 }
0x1974   :  { %v3246_v14 = vpop.f32.mrb[36].mxu0 }
0x1975   :  { %v3250_v35 = vadd.f32 %v3246_v14, %v2790_v57  ;;  %v4377_v31 = vpop.f32.mrb[37].mxu0 }
0x197c   :  { %v3396_v36 = vpop.f32.mrb[38].mxu0 }
0x197d   :  { %v4399_v42 = vpop.f32.mrb[39].mxu0  ;;  %4412 = vmatpush3.xpose.msk.msra.mxu0 %vm249_vm2, %v3396_v36 }
0x197e   :  { %4416 = vmatprep.subr.mxu0 %v4634_v11 }
0x1980   :  { %4414 = vmatmul.mubr.msk.f32.vlgmr.msra.gmra.mrb[40].mxu0 %vm249_vm2, %v3325_v40 }
0x1981   :  { %4418 = vmatprep.mubr.msk.f32.mxu0 %vm4633_vm0, %v4634_v11  ;;  %4417 = vmatpush3.msra.mxu0 %v3470_v51 }
0x1a53   :  { %v3546_v3 = vpop.f32.mrb[40].mxu0 }
0x1a54   :  { %v4415_v39 = vpop.f32.mrb[41].mxu0  ;;  %v3550_v19 = vsel %vm249_vm2, %v3546_v3, -inf }
0x1a55   :  { %3551 = vmax.xlane.f32.xlu0 %v3550_v19 }
0x1ae2   :  { %v3552_v43 = vpop.xlane.xlu0 %3551 }
0x1ae3   :  { %v3553_v44 = vsub.f32 %v3546_v3, %v3552_v43 }
0x1ae5   :  { %v3554_v47 = vmul.f32 1.442695, %v3553_v44 }
0x1ae7   :  { %4604 = vpow2.f32 %v3554_v47 }
0x1af1   :  { %v4605_v48 = vpop.eup %4604 }
0x1af2   :  { %v3556_v49 = vsel %vm249_vm2, %v4605_v48, 0.0 }
0x1af3   :  { %3557 = vadd.xlane.f32.xlu1 %v3556_v49 }
0x1b80   :  { %v3558_v45 = vpop.xlane.xlu1 %3557 }
0x1b81   :  { %4606 = vrcp.f32 %v3558_v45 }
0x1b8b   :  { %v4607_v46 = vpop.eup %4606 }
0x1b8c   :  { %v3560_v11 = vmul.f32 %v4607_v46, %v4605_v48 }
0x1b8e   :  { %4419 = vmatmul.mubr.msk.f32.vlgmr.msra.gmra.mrb[42].mxu0 %vm249_vm2, %v3560_v11 }
0x1c61   :  { %v3630_v53 = vpop.f32.mrb[42].mxu0 }
0x1c62   :  { %v4420_v56 = vpop.f32.mrb[43].mxu0  ;;  %4424 = vmatmul.mubr.msk.f32.vlgmr.msra.gmra.mrb[50].mxu1 %vm249_vm2, %v3630_v53 }
0x1d35   :  { %v3704_v50 = vpop.f32.mrb[50].mxu1 }
0x1d36   :  { %v3708_v59 = vadd.f32 %v3704_v50, %v3250_v35  ;;  %v4425_v60 = vpop.f32.mrb[51].mxu1 }
0x1d38   :  { %v3709_v62 = vadd.f32 %v5101_v8, %v3708_v59 }
0x1d3a   :  { %3711 = vst.msk [vmem:[#allocation2 + $0x8] sm:$0xff] %vm24_vm1, %v3709_v62 }
0x1d3b   :  { %4619 = shalt.err (!%p4616_p4)
}
0x1d3c   :  { %s4620_s22 = scalar_lea.hbm %s5236_s4, 256 }
0x1d3d   :  { %p4621_p5 = scmp.ne.s32.totalorder %s5236_s4, %s4620_s22  ;;  %p4624_p6 = scmp.lt.u32.totalorder %s4620_s22, %s5236_s4 }
0x1d3f   :  { %p4626_p7 = pnand %p4624_p6, %p4621_p5 }
0x1d41   :  { %4629 = shalt.err (!%p4626_p7)
}
0x1d42   :  { %s4636_s27 = smov 128   ;;  %s4637_s28 = smov 8  }
0x1d43   :  { %3723 = dma.vmem_to_hbm [thread:$0]  %s3718_s18, 256, %s5236_s4, [#allocation3], %s4636_s27, %s4636_s27, %s4637_s28  }
0x1d44   :  { %4630 = dma.done.wait [#allocation3], 256  }
0x1d45   :  { %4631 = vsyncadd [#allocation3], 4294967040 }
0x1d46   :  { %3727 = vsyncpa [#allocation3], 1 }

</bundles_post_ra>
